<compile_context>
chip_gen: v7x
topology: tpu7x:2x2x1
jax: 0.10.0
libtpu: 0.0.40
codegen_flags: <defaults>
</compile_context>

<pallas_src>
import jax
import jax.numpy as jnp
from jax.experimental import pallas as pl
from jax.experimental.pallas import tpu as pltpu

_SQRT_HALF = 0.7071067811865476
_LN_EPS = 1e-5


def _gelu_exact(v):
    """Exact (erf-based) GELU matching torch.nn.GELU(); erf via A&S 7.1.26."""
    z = v * _SQRT_HALF
    az = jnp.abs(z)
    t = 1.0 / (1.0 + 0.3275911 * az)
    poly = ((((1.061405429 * t - 1.453152027) * t + 1.421413741) * t
             - 0.284496736) * t + 0.254829592) * t
    erf_abs = 1.0 - poly * jnp.exp(-az * az)
    erf_z = jnp.where(z < 0, -erf_abs, erf_abs)
    return 0.5 * v * (1.0 + erf_z)


def _mixer_block_kernel(x_ref, ln_w_ref, ln_b_ref,
                        ws1_ref, bs1_ref, ws2_ref, bs2_ref,
                        wm1t_ref, bm1_ref, wm2t_ref, bm2_ref,
                        out_ref):
    # x_ref/out_ref: (G, S, D).  ln_w/ln_b/bm1/bm2: (1, D).  ws1/ws2: (S, S).
    # bs1/bs2: (S, 1).  wm1t/wm2t: (D, D) pre-transposed to (in, out).
    g, s, d = x_ref.shape
    x = x_ref[...]
    ln_w = ln_w_ref[...]
    ln_b = ln_b_ref[...]

    def layer_norm(v):
        mu = jnp.mean(v, axis=-1, keepdims=True)
        c = v - mu
        var = jnp.mean(c * c, axis=-1, keepdims=True)
        inv = 1.0 / jnp.sqrt(var + _LN_EPS)
        return c * inv * ln_w + ln_b

    # Hoisted weight broadcasts: one batched matmul per linear, no transposes.
    ws1 = jnp.broadcast_to(ws1_ref[...], (g, s, s))
    ws2 = jnp.broadcast_to(ws2_ref[...], (g, s, s))
    wm1t = jnp.broadcast_to(wm1t_ref[...], (g, d, d))
    wm2t = jnp.broadcast_to(wm2t_ref[...], (g, d, d))

    hp = jax.lax.Precision.HIGHEST

    # ---- y = LN(x); sequence mixing along S without materializing (B, D, S) ----
    y = layer_norm(x)
    h = jnp.einsum('gij,gjd->gid', ws1, y, precision=hp,
                   preferred_element_type=jnp.float32) + bs1_ref[...]
    h = _gelu_exact(h)
    y_seq = jnp.einsum('gij,gjd->gid', ws2, h, precision=hp,
                       preferred_element_type=jnp.float32) + bs2_ref[...]

    # ---- residual + second LN (of the pre-residual seq-mix output) ----
    x_res = x + y_seq
    y = layer_norm(y_seq)

    # ---- channel (modal) mixing along D ----
    m = jnp.einsum('gsd,gde->gse', y, wm1t, precision=hp,
                   preferred_element_type=jnp.float32) + bm1_ref[...]
    m = _gelu_exact(m)
    m = jnp.einsum('gsd,gde->gse', m, wm2t, precision=hp,
                   preferred_element_type=jnp.float32) + bm2_ref[...]

    out_ref[...] = (m + x_res).astype(out_ref.dtype)


def _pick_block_b(B, S, D, target_bytes=2 << 20):
    """Group batch elements so each grid step is ~2 MiB of live f32 state."""
    per_batch = 4 * (8 * S * D + 2 * S * S + 2 * D * D)
    g = max(1, min(B, target_bytes // max(per_batch, 1)))
    if B >= 2:
        g = min(g, max(1, B // 2))   # keep >=2 grid steps (v7x has 2 TensorCores)
    while B % g:
        g -= 1
    return g


def mixer_block(x, ln_w, ln_b, Ws1, bs1, Ws2, bs2, Wm1, bm1, Wm2, bm2, *, block_b=None):
    """x: (B, S, D) f32. Linear weights in PyTorch (out_features, in_features) layout."""
    B, S, D = x.shape
    f32 = jnp.float32
    x = x.astype(f32)
    ln_w2 = ln_w.reshape(1, D).astype(f32)
    ln_b2 = ln_b.reshape(1, D).astype(f32)
    ws1 = Ws1.astype(f32)                   # (S, S): used as a left-multiply (out, in)
    bs1c = bs1.reshape(S, 1).astype(f32)    # bias broadcast along D
    ws2 = Ws2.astype(f32)
    bs2c = bs2.reshape(S, 1).astype(f32)
    wm1t = Wm1.T.astype(f32)                # (in, out): kernel contracts lane dim directly
    bm1r = bm1.reshape(1, D).astype(f32)
    wm2t = Wm2.T.astype(f32)
    bm2r = bm2.reshape(1, D).astype(f32)

    if block_b is None:
        block_b = _pick_block_b(B, S, D)
    assert B % block_b == 0, (B, block_b)
    grid = (B // block_b,)

    cost = pl.CostEstimate(
        flops=4 * B * S * D * (S + D),
        transcendentals=2 * B * S * D,
        bytes_accessed=4 * (2 * B * S * D + 2 * S * S + 2 * D * D + 2 * S + 6 * D),
    )

    full2d = lambda b: (0, 0)
    out = pl.pallas_call(
        _mixer_block_kernel,
        out_shape=jax.ShapeDtypeStruct((B, S, D), f32),
        grid=grid,
        in_specs=[
            pl.BlockSpec((block_b, S, D), lambda b: (b, 0, 0)),   # x
            pl.BlockSpec((1, D), full2d),                         # ln weight
            pl.BlockSpec((1, D), full2d),                         # ln bias
            pl.BlockSpec((S, S), full2d),                         # seq fc1 W
            pl.BlockSpec((S, 1), full2d),                         # seq fc1 b
            pl.BlockSpec((S, S), full2d),                         # seq fc2 W
            pl.BlockSpec((S, 1), full2d),                         # seq fc2 b
            pl.BlockSpec((D, D), full2d),                         # modal fc1 W^T
            pl.BlockSpec((1, D), full2d),                         # modal fc1 b
            pl.BlockSpec((D, D), full2d),                         # modal fc2 W^T
            pl.BlockSpec((1, D), full2d),                         # modal fc2 b
        ],
        out_specs=pl.BlockSpec((block_b, S, D), lambda b: (b, 0, 0)),
        compiler_params=pltpu.CompilerParams(dimension_semantics=("parallel",)),
        cost_estimate=cost,
    )(x, ln_w2, ln_b2, ws1, bs1c, ws2, bs2c, wm1t, bm1r, wm2t, bm2r)
    return out


def ref_mixer_block(x, ln_w, ln_b, Ws1, bs1, Ws2, bs2, Wm1, bm1, Wm2, bm2):
    """Pure-JAX reference mirroring the PyTorch forward exactly (dropout = identity)."""
    hp = jax.lax.Precision.HIGHEST

    def ln(v):
        mu = jnp.mean(v, -1, keepdims=True)
        var = jnp.mean((v - mu) ** 2, -1, keepdims=True)
        return (v - mu) / jnp.sqrt(var + _LN_EPS) * ln_w + ln_b

    def mlp(v, W1, b1, W2, b2):
        h = jax.nn.gelu(jnp.einsum('...i,oi->...o', v, W1, precision=hp) + b1,
                        approximate=False)
        return jnp.einsum('...i,oi->...o', h, W2, precision=hp) + b2

    y = ln(x)
    y = jnp.swapaxes(y, 1, 2)
    y = mlp(y, Ws1, bs1, Ws2, bs2)
    y = jnp.swapaxes(y, 1, 2)
    x = x + y
    y = ln(y)
    y = mlp(y, Wm1, bm1, Wm2, bm2)
    return y + x


if __name__ == "__main__":
    B, SEQ, DIM = 4, 8, 32   # x: (batch, sequence_length, input_dim)

    key = jax.random.PRNGKey(0)
    keys = jax.random.split(key, 11)
    x = jax.random.normal(keys[0], (B, SEQ, DIM), jnp.float32)

    # LayerNorm affine params (shared between both LN applications, as in the module).
    ln_w = 1.0 + 0.1 * jax.random.normal(keys[1], (DIM,), jnp.float32)
    ln_b = 0.1 * jax.random.normal(keys[2], (DIM,), jnp.float32)

    def linear_init(kw, kb, out_f, in_f):
        bound = 1.0 / jnp.sqrt(jnp.float32(in_f))
        W = jax.random.uniform(kw, (out_f, in_f), jnp.float32, -bound, bound)
        b = jax.random.uniform(kb, (out_f,), jnp.float32, -bound, bound)
        return W, b

    Ws1, bs1 = linear_init(keys[3], keys[4], SEQ, SEQ)    # sequence_mixing.fc
    Ws2, bs2 = linear_init(keys[5], keys[6], SEQ, SEQ)    # sequence_mixing.fc2
    Wm1, bm1 = linear_init(keys[7], keys[8], DIM, DIM)    # modal_mixing.fc
    Wm2, bm2 = linear_init(keys[9], keys[10], DIM, DIM)   # modal_mixing.fc2

    params = (ln_w, ln_b, Ws1, bs1, Ws2, bs2, Wm1, bm1, Wm2, bm2)

    out = mixer_block(x, *params)
    jax.block_until_ready(out)

    out_ref = ref_mixer_block(x, *params)
    assert out.shape == (B, SEQ, DIM)
    assert jnp.allclose(out, out_ref, atol=2e-5, rtol=2e-5), \
        float(jnp.max(jnp.abs(out - out_ref)))

    print("KERNEL_OK")
</pallas_src>

<mosaic_0001>
module attributes {stable_mosaic.version = 11 : i64} {
  func.func @_mixer_block_kernel(%arg0: i32, %arg1: memref<2x8x32xf32, #tpu.memory_space<vmem>>, %arg2: memref<1x32xf32, #tpu.memory_space<vmem>>, %arg3: memref<1x32xf32, #tpu.memory_space<vmem>>, %arg4: memref<8x8xf32, #tpu.memory_space<vmem>>, %arg5: memref<8x1xf32, #tpu.memory_space<vmem>>, %arg6: memref<8x8xf32, #tpu.memory_space<vmem>>, %arg7: memref<8x1xf32, #tpu.memory_space<vmem>>, %arg8: memref<32x32xf32, #tpu.memory_space<vmem>>, %arg9: memref<1x32xf32, #tpu.memory_space<vmem>>, %arg10: memref<32x32xf32, #tpu.memory_space<vmem>>, %arg11: memref<1x32xf32, #tpu.memory_space<vmem>>, %arg12: memref<2x8x32xf32, #tpu.memory_space<vmem>>) attributes {dimension_semantics = [#tpu.dimension_semantics<parallel>], iteration_bounds = array<i64: 2>, scalar_prefetch = 0 : i64, scratch_operands = 0 : i64, tpu.core_type = #tpu.core_type<tc>, window_params = [{transform_indices = @transform_0, window_bounds = array<i64: 2, 8, 32>}, {pipeline_mode = #tpu.pipeline_mode<synchronous>, transform_indices = @transform_1, window_bounds = array<i64: 1, 32>}, {pipeline_mode = #tpu.pipeline_mode<synchronous>, transform_indices = @transform_2, window_bounds = array<i64: 1, 32>}, {pipeline_mode = #tpu.pipeline_mode<synchronous>, transform_indices = @transform_3, window_bounds = array<i64: 8, 8>}, {pipeline_mode = #tpu.pipeline_mode<synchronous>, transform_indices = @transform_4, window_bounds = array<i64: 8, 1>}, {pipeline_mode = #tpu.pipeline_mode<synchronous>, transform_indices = @transform_5, window_bounds = array<i64: 8, 8>}, {pipeline_mode = #tpu.pipeline_mode<synchronous>, transform_indices = @transform_6, window_bounds = array<i64: 8, 1>}, {pipeline_mode = #tpu.pipeline_mode<synchronous>, transform_indices = @transform_7, window_bounds = array<i64: 32, 32>}, {pipeline_mode = #tpu.pipeline_mode<synchronous>, transform_indices = @transform_8, window_bounds = array<i64: 1, 32>}, {pipeline_mode = #tpu.pipeline_mode<synchronous>, transform_indices = @transform_9, window_bounds = array<i64: 32, 32>}, {pipeline_mode = #tpu.pipeline_mode<synchronous>, transform_indices = @transform_10, window_bounds = array<i64: 1, 32>}, {transform_indices = @transform_11, window_bounds = array<i64: 2, 8, 32>}]} {
    %c0 = arith.constant 0 : index
    %c0_0 = arith.constant 0 : index
    %c0_1 = arith.constant 0 : index
    %0 = vector.load %arg1[%c0, %c0_0, %c0_1] : memref<2x8x32xf32, #tpu.memory_space<vmem>>, vector<2x8x32xf32>
    %c0_2 = arith.constant 0 : index
    %c0_3 = arith.constant 0 : index
    %1 = vector.load %arg2[%c0_2, %c0_3] : memref<1x32xf32, #tpu.memory_space<vmem>>, vector<1x32xf32>
    %c0_4 = arith.constant 0 : index
    %c0_5 = arith.constant 0 : index
    %2 = vector.load %arg3[%c0_4, %c0_5] : memref<1x32xf32, #tpu.memory_space<vmem>>, vector<1x32xf32>
    %c0_6 = arith.constant 0 : index
    %c0_7 = arith.constant 0 : index
    %3 = vector.load %arg4[%c0_6, %c0_7] : memref<8x8xf32, #tpu.memory_space<vmem>>, vector<8x8xf32>
    %4 = vector.shape_cast %3 : vector<8x8xf32> to vector<1x8x8xf32>
    %5 = vector.broadcast %4 : vector<1x8x8xf32> to vector<2x8x8xf32>
    %c0_8 = arith.constant 0 : index
    %c0_9 = arith.constant 0 : index
    %6 = vector.load %arg6[%c0_8, %c0_9] : memref<8x8xf32, #tpu.memory_space<vmem>>, vector<8x8xf32>
    %7 = vector.shape_cast %6 : vector<8x8xf32> to vector<1x8x8xf32>
    %8 = vector.broadcast %7 : vector<1x8x8xf32> to vector<2x8x8xf32>
    %c0_10 = arith.constant 0 : index
    %c0_11 = arith.constant 0 : index
    %9 = vector.load %arg8[%c0_10, %c0_11] : memref<32x32xf32, #tpu.memory_space<vmem>>, vector<32x32xf32>
    %10 = vector.shape_cast %9 : vector<32x32xf32> to vector<1x32x32xf32>
    %11 = vector.broadcast %10 : vector<1x32x32xf32> to vector<2x32x32xf32>
    %c0_12 = arith.constant 0 : index
    %c0_13 = arith.constant 0 : index
    %12 = vector.load %arg10[%c0_12, %c0_13] : memref<32x32xf32, #tpu.memory_space<vmem>>, vector<32x32xf32>
    %13 = vector.shape_cast %12 : vector<32x32xf32> to vector<1x32x32xf32>
    %14 = vector.broadcast %13 : vector<1x32x32xf32> to vector<2x32x32xf32>
    %cst = arith.constant dense<0.000000e+00> : vector<2x8xf32>
    %15 = vector.multi_reduction <add>, %0, %cst [2] : vector<2x8x32xf32> to vector<2x8xf32>
    %16 = vector.shape_cast %15 : vector<2x8xf32> to vector<2x8x1xf32>
    %cst_14 = arith.constant 3.200000e+01 : f32
    %17 = vector.broadcast %cst_14 : f32 to vector<2x8x1xf32>
    %18 = arith.divf %16, %17 : vector<2x8x1xf32>
    %19 = vector.broadcast %18 : vector<2x8x1xf32> to vector<2x8x32xf32>
    %20 = arith.subf %0, %19 : vector<2x8x32xf32>
    %21 = arith.mulf %20, %20 : vector<2x8x32xf32>
    %cst_15 = arith.constant dense<0.000000e+00> : vector<2x8xf32>
    %22 = vector.multi_reduction <add>, %21, %cst_15 [2] : vector<2x8x32xf32> to vector<2x8xf32>
    %23 = vector.shape_cast %22 : vector<2x8xf32> to vector<2x8x1xf32>
    %cst_16 = arith.constant 3.200000e+01 : f32
    %24 = vector.broadcast %cst_16 : f32 to vector<2x8x1xf32>
    %25 = arith.divf %23, %24 : vector<2x8x1xf32>
    %cst_17 = arith.constant 9.99999974E-6 : f32
    %26 = vector.broadcast %cst_17 : f32 to vector<2x8x1xf32>
    %27 = arith.addf %25, %26 : vector<2x8x1xf32>
    %28 = math.sqrt %27 : vector<2x8x1xf32>
    %cst_18 = arith.constant 1.000000e+00 : f32
    %29 = vector.broadcast %cst_18 : f32 to vector<2x8x1xf32>
    %30 = arith.divf %29, %28 : vector<2x8x1xf32>
    %31 = vector.broadcast %30 : vector<2x8x1xf32> to vector<2x8x32xf32>
    %32 = arith.mulf %20, %31 : vector<2x8x32xf32>
    %33 = vector.shape_cast %1 : vector<1x32xf32> to vector<1x1x32xf32>
    %34 = vector.broadcast %33 : vector<1x1x32xf32> to vector<2x8x32xf32>
    %35 = arith.mulf %32, %34 : vector<2x8x32xf32>
    %36 = vector.shape_cast %2 : vector<1x32xf32> to vector<1x1x32xf32>
    %37 = vector.broadcast %36 : vector<1x1x32xf32> to vector<2x8x32xf32>
    %38 = arith.addf %35, %37 : vector<2x8x32xf32>
    "tpu.trace_start"() <{level = 10 : i32, message = "gij,gjd->gid"}> : () -> ()
    %cst_19 = arith.constant dense<0.000000e+00> : vector<2x8x32xf32>
    %39 = tpu.matmul %5, %38, %cst_19 {dimension_numbers = #tpu.dot_dimension_numbers<[2], [1], [1], [2], [0, 0, 0, 1, 1, 2], [0], [0]>, precision = #tpu.contract_precision<fp32>} : vector<2x8x8xf32>, vector<2x8x32xf32>, vector<2x8x32xf32> -> vector<2x8x32xf32>
    "tpu.trace_stop"() : () -> ()
    %c0_20 = arith.constant 0 : index
    %c0_21 = arith.constant 0 : index
    %40 = vector.load %arg5[%c0_20, %c0_21] : memref<8x1xf32, #tpu.memory_space<vmem>>, vector<8x1xf32>
    %41 = vector.shape_cast %40 : vector<8x1xf32> to vector<1x8x1xf32>
    %42 = vector.broadcast %41 : vector<1x8x1xf32> to vector<2x8x32xf32>
    %43 = arith.addf %39, %42 : vector<2x8x32xf32>
    %cst_22 = arith.constant 0.707106769 : f32
    %44 = vector.broadcast %cst_22 : f32 to vector<2x8x32xf32>
    %45 = arith.mulf %43, %44 : vector<2x8x32xf32>
    %46 = math.absf %45 : vector<2x8x32xf32>
    %cst_23 = arith.constant 0.327591091 : f32
    %47 = vector.broadcast %cst_23 : f32 to vector<2x8x32xf32>
    %48 = arith.mulf %47, %46 : vector<2x8x32xf32>
    %cst_24 = arith.constant 1.000000e+00 : f32
    %49 = vector.broadcast %cst_24 : f32 to vector<2x8x32xf32>
    %50 = arith.addf %49, %48 : vector<2x8x32xf32>
    %cst_25 = arith.constant 1.000000e+00 : f32
    %51 = vector.broadcast %cst_25 : f32 to vector<2x8x32xf32>
    %52 = arith.divf %51, %50 : vector<2x8x32xf32>
    %cst_26 = arith.constant 1.06140542 : f32
    %53 = vector.broadcast %cst_26 : f32 to vector<2x8x32xf32>
    %54 = arith.mulf %53, %52 : vector<2x8x32xf32>
    %cst_27 = arith.constant 1.45315206 : f32
    %55 = vector.broadcast %cst_27 : f32 to vector<2x8x32xf32>
    %56 = arith.subf %54, %55 : vector<2x8x32xf32>
    %57 = arith.mulf %56, %52 : vector<2x8x32xf32>
    %cst_28 = arith.constant 1.42141378 : f32
    %58 = vector.broadcast %cst_28 : f32 to vector<2x8x32xf32>
    %59 = arith.addf %57, %58 : vector<2x8x32xf32>
    %60 = arith.mulf %59, %52 : vector<2x8x32xf32>
    %cst_29 = arith.constant 0.284496725 : f32
    %61 = vector.broadcast %cst_29 : f32 to vector<2x8x32xf32>
    %62 = arith.subf %60, %61 : vector<2x8x32xf32>
    %63 = arith.mulf %62, %52 : vector<2x8x32xf32>
    %cst_30 = arith.constant 0.254829586 : f32
    %64 = vector.broadcast %cst_30 : f32 to vector<2x8x32xf32>
    %65 = arith.addf %63, %64 : vector<2x8x32xf32>
    %66 = arith.mulf %65, %52 : vector<2x8x32xf32>
    %cst_31 = arith.constant 0.000000e+00 : f32
    %67 = vector.broadcast %cst_31 : f32 to vector<2x8x32xf32>
    %68 = arith.subf %67, %46 : vector<2x8x32xf32>
    %69 = arith.mulf %68, %46 : vector<2x8x32xf32>
    %70 = math.exp %69 : vector<2x8x32xf32>
    %71 = arith.mulf %66, %70 : vector<2x8x32xf32>
    %cst_32 = arith.constant 1.000000e+00 : f32
    %72 = vector.broadcast %cst_32 : f32 to vector<2x8x32xf32>
    %73 = arith.subf %72, %71 : vector<2x8x32xf32>
    %cst_33 = arith.constant 0.000000e+00 : f32
    %74 = vector.broadcast %cst_33 : f32 to vector<2x8x32xf32>
    %75 = arith.cmpf olt, %45, %74 : vector<2x8x32xf32>
    %cst_34 = arith.constant 0.000000e+00 : f32
    %76 = vector.broadcast %cst_34 : f32 to vector<2x8x32xf32>
    %77 = arith.subf %76, %73 : vector<2x8x32xf32>
    %78 = arith.select %75, %77, %73 : vector<2x8x32xi1>, vector<2x8x32xf32>
    %cst_35 = arith.constant 5.000000e-01 : f32
    %79 = vector.broadcast %cst_35 : f32 to vector<2x8x32xf32>
    %80 = arith.mulf %79, %43 : vector<2x8x32xf32>
    %cst_36 = arith.constant 1.000000e+00 : f32
    %81 = vector.broadcast %cst_36 : f32 to vector<2x8x32xf32>
    %82 = arith.addf %81, %78 : vector<2x8x32xf32>
    %83 = arith.mulf %80, %82 : vector<2x8x32xf32>
    "tpu.trace_start"() <{level = 10 : i32, message = "gij,gjd->gid"}> : () -> ()
    %cst_37 = arith.constant dense<0.000000e+00> : vector<2x8x32xf32>
    %84 = tpu.matmul %8, %83, %cst_37 {dimension_numbers = #tpu.dot_dimension_numbers<[2], [1], [1], [2], [0, 0, 0, 1, 1, 2], [0], [0]>, precision = #tpu.contract_precision<fp32>} : vector<2x8x8xf32>, vector<2x8x32xf32>, vector<2x8x32xf32> -> vector<2x8x32xf32>
    "tpu.trace_stop"() : () -> ()
    %c0_38 = arith.constant 0 : index
    %c0_39 = arith.constant 0 : index
    %85 = vector.load %arg7[%c0_38, %c0_39] : memref<8x1xf32, #tpu.memory_space<vmem>>, vector<8x1xf32>
    %86 = vector.shape_cast %85 : vector<8x1xf32> to vector<1x8x1xf32>
    %87 = vector.broadcast %86 : vector<1x8x1xf32> to vector<2x8x32xf32>
    %88 = arith.addf %84, %87 : vector<2x8x32xf32>
    %89 = arith.addf %0, %88 : vector<2x8x32xf32>
    %cst_40 = arith.constant dense<0.000000e+00> : vector<2x8xf32>
    %90 = vector.multi_reduction <add>, %88, %cst_40 [2] : vector<2x8x32xf32> to vector<2x8xf32>
    %91 = vector.shape_cast %90 : vector<2x8xf32> to vector<2x8x1xf32>
    %cst_41 = arith.constant 3.200000e+01 : f32
    %92 = vector.broadcast %cst_41 : f32 to vector<2x8x1xf32>
    %93 = arith.divf %91, %92 : vector<2x8x1xf32>
    %94 = vector.broadcast %93 : vector<2x8x1xf32> to vector<2x8x32xf32>
    %95 = arith.subf %88, %94 : vector<2x8x32xf32>
    %96 = arith.mulf %95, %95 : vector<2x8x32xf32>
    %cst_42 = arith.constant dense<0.000000e+00> : vector<2x8xf32>
    %97 = vector.multi_reduction <add>, %96, %cst_42 [2] : vector<2x8x32xf32> to vector<2x8xf32>
    %98 = vector.shape_cast %97 : vector<2x8xf32> to vector<2x8x1xf32>
    %cst_43 = arith.constant 3.200000e+01 : f32
    %99 = vector.broadcast %cst_43 : f32 to vector<2x8x1xf32>
    %100 = arith.divf %98, %99 : vector<2x8x1xf32>
    %cst_44 = arith.constant 9.99999974E-6 : f32
    %101 = vector.broadcast %cst_44 : f32 to vector<2x8x1xf32>
    %102 = arith.addf %100, %101 : vector<2x8x1xf32>
    %103 = math.sqrt %102 : vector<2x8x1xf32>
    %cst_45 = arith.constant 1.000000e+00 : f32
    %104 = vector.broadcast %cst_45 : f32 to vector<2x8x1xf32>
    %105 = arith.divf %104, %103 : vector<2x8x1xf32>
    %106 = vector.broadcast %105 : vector<2x8x1xf32> to vector<2x8x32xf32>
    %107 = arith.mulf %95, %106 : vector<2x8x32xf32>
    %108 = vector.shape_cast %1 : vector<1x32xf32> to vector<1x1x32xf32>
    %109 = vector.broadcast %108 : vector<1x1x32xf32> to vector<2x8x32xf32>
    %110 = arith.mulf %107, %109 : vector<2x8x32xf32>
    %111 = vector.shape_cast %2 : vector<1x32xf32> to vector<1x1x32xf32>
    %112 = vector.broadcast %111 : vector<1x1x32xf32> to vector<2x8x32xf32>
    %113 = arith.addf %110, %112 : vector<2x8x32xf32>
    "tpu.trace_start"() <{level = 10 : i32, message = "gsd,gde->gse"}> : () -> ()
    %cst_46 = arith.constant dense<0.000000e+00> : vector<2x8x32xf32>
    %114 = tpu.matmul %113, %11, %cst_46 {dimension_numbers = #tpu.dot_dimension_numbers<[2], [1], [1], [2], [0, 0, 0, 1, 1, 2], [0], [0]>, precision = #tpu.contract_precision<fp32>} : vector<2x8x32xf32>, vector<2x32x32xf32>, vector<2x8x32xf32> -> vector<2x8x32xf32>
    "tpu.trace_stop"() : () -> ()
    %c0_47 = arith.constant 0 : index
    %c0_48 = arith.constant 0 : index
    %115 = vector.load %arg9[%c0_47, %c0_48] : memref<1x32xf32, #tpu.memory_space<vmem>>, vector<1x32xf32>
    %116 = vector.shape_cast %115 : vector<1x32xf32> to vector<1x1x32xf32>
    %117 = vector.broadcast %116 : vector<1x1x32xf32> to vector<2x8x32xf32>
    %118 = arith.addf %114, %117 : vector<2x8x32xf32>
    %cst_49 = arith.constant 0.707106769 : f32
    %119 = vector.broadcast %cst_49 : f32 to vector<2x8x32xf32>
    %120 = arith.mulf %118, %119 : vector<2x8x32xf32>
    %121 = math.absf %120 : vector<2x8x32xf32>
    %cst_50 = arith.constant 0.327591091 : f32
    %122 = vector.broadcast %cst_50 : f32 to vector<2x8x32xf32>
    %123 = arith.mulf %122, %121 : vector<2x8x32xf32>
    %cst_51 = arith.constant 1.000000e+00 : f32
    %124 = vector.broadcast %cst_51 : f32 to vector<2x8x32xf32>
    %125 = arith.addf %124, %123 : vector<2x8x32xf32>
    %cst_52 = arith.constant 1.000000e+00 : f32
    %126 = vector.broadcast %cst_52 : f32 to vector<2x8x32xf32>
    %127 = arith.divf %126, %125 : vector<2x8x32xf32>
    %cst_53 = arith.constant 1.06140542 : f32
    %128 = vector.broadcast %cst_53 : f32 to vector<2x8x32xf32>
    %129 = arith.mulf %128, %127 : vector<2x8x32xf32>
    %cst_54 = arith.constant 1.45315206 : f32
    %130 = vector.broadcast %cst_54 : f32 to vector<2x8x32xf32>
    %131 = arith.subf %129, %130 : vector<2x8x32xf32>
    %132 = arith.mulf %131, %127 : vector<2x8x32xf32>
    %cst_55 = arith.constant 1.42141378 : f32
    %133 = vector.broadcast %cst_55 : f32 to vector<2x8x32xf32>
    %134 = arith.addf %132, %133 : vector<2x8x32xf32>
    %135 = arith.mulf %134, %127 : vector<2x8x32xf32>
    %cst_56 = arith.constant 0.284496725 : f32
    %136 = vector.broadcast %cst_56 : f32 to vector<2x8x32xf32>
    %137 = arith.subf %135, %136 : vector<2x8x32xf32>
    %138 = arith.mulf %137, %127 : vector<2x8x32xf32>
    %cst_57 = arith.constant 0.254829586 : f32
    %139 = vector.broadcast %cst_57 : f32 to vector<2x8x32xf32>
    %140 = arith.addf %138, %139 : vector<2x8x32xf32>
    %141 = arith.mulf %140, %127 : vector<2x8x32xf32>
    %cst_58 = arith.constant 0.000000e+00 : f32
    %142 = vector.broadcast %cst_58 : f32 to vector<2x8x32xf32>
    %143 = arith.subf %142, %121 : vector<2x8x32xf32>
    %144 = arith.mulf %143, %121 : vector<2x8x32xf32>
    %145 = math.exp %144 : vector<2x8x32xf32>
    %146 = arith.mulf %141, %145 : vector<2x8x32xf32>
    %cst_59 = arith.constant 1.000000e+00 : f32
    %147 = vector.broadcast %cst_59 : f32 to vector<2x8x32xf32>
    %148 = arith.subf %147, %146 : vector<2x8x32xf32>
    %cst_60 = arith.constant 0.000000e+00 : f32
    %149 = vector.broadcast %cst_60 : f32 to vector<2x8x32xf32>
    %150 = arith.cmpf olt, %120, %149 : vector<2x8x32xf32>
    %cst_61 = arith.constant 0.000000e+00 : f32
    %151 = vector.broadcast %cst_61 : f32 to vector<2x8x32xf32>
    %152 = arith.subf %151, %148 : vector<2x8x32xf32>
    %153 = arith.select %150, %152, %148 : vector<2x8x32xi1>, vector<2x8x32xf32>
    %cst_62 = arith.constant 5.000000e-01 : f32
    %154 = vector.broadcast %cst_62 : f32 to vector<2x8x32xf32>
    %155 = arith.mulf %154, %118 : vector<2x8x32xf32>
    %cst_63 = arith.constant 1.000000e+00 : f32
    %156 = vector.broadcast %cst_63 : f32 to vector<2x8x32xf32>
    %157 = arith.addf %156, %153 : vector<2x8x32xf32>
    %158 = arith.mulf %155, %157 : vector<2x8x32xf32>
    "tpu.trace_start"() <{level = 10 : i32, message = "gsd,gde->gse"}> : () -> ()
    %cst_64 = arith.constant dense<0.000000e+00> : vector<2x8x32xf32>
    %159 = tpu.matmul %158, %14, %cst_64 {dimension_numbers = #tpu.dot_dimension_numbers<[2], [1], [1], [2], [0, 0, 0, 1, 1, 2], [0], [0]>, precision = #tpu.contract_precision<fp32>} : vector<2x8x32xf32>, vector<2x32x32xf32>, vector<2x8x32xf32> -> vector<2x8x32xf32>
    "tpu.trace_stop"() : () -> ()
    %c0_65 = arith.constant 0 : index
    %c0_66 = arith.constant 0 : index
    %160 = vector.load %arg11[%c0_65, %c0_66] : memref<1x32xf32, #tpu.memory_space<vmem>>, vector<1x32xf32>
    %161 = vector.shape_cast %160 : vector<1x32xf32> to vector<1x1x32xf32>
    %162 = vector.broadcast %161 : vector<1x1x32xf32> to vector<2x8x32xf32>
    %163 = arith.addf %159, %162 : vector<2x8x32xf32>
    %164 = arith.addf %163, %89 : vector<2x8x32xf32>
    %c0_67 = arith.constant 0 : index
    %c0_68 = arith.constant 0 : index
    %c0_69 = arith.constant 0 : index
    %165 = vector.load %arg12[%c0_67, %c0_68, %c0_69] : memref<2x8x32xf32, #tpu.memory_space<vmem>>, vector<2x8x32xf32>
    tpu.vector_store %arg12[%c0_67, %c0_68, %c0_69], %164 {strides = array<i32>} : memref<2x8x32xf32, #tpu.memory_space<vmem>>, vector<2x8x32xf32>,
    return
  }
  func.func @transform_0(%arg0: i32) -> (i32, i32, i32) {
    %c0_i32 = arith.constant 0 : i32
    %c0_i32_0 = arith.constant 0 : i32
    %c0_i32_1 = arith.constant 0 : i32
    return %arg0, %c0_i32, %c0_i32_0 : i32, i32, i32
  }
  func.func @transform_1(%arg0: i32) -> (i32, i32) {
    %c0_i32 = arith.constant 0 : i32
    %c0_i32_0 = arith.constant 0 : i32
    %c0_i32_1 = arith.constant 0 : i32
    return %c0_i32, %c0_i32_0 : i32, i32
  }
  func.func @transform_2(%arg0: i32) -> (i32, i32) {
    %c0_i32 = arith.constant 0 : i32
    %c0_i32_0 = arith.constant 0 : i32
    %c0_i32_1 = arith.constant 0 : i32
    return %c0_i32, %c0_i32_0 : i32, i32
  }
  func.func @transform_3(%arg0: i32) -> (i32, i32) {
    %c0_i32 = arith.constant 0 : i32
    %c0_i32_0 = arith.constant 0 : i32
    %c0_i32_1 = arith.constant 0 : i32
    return %c0_i32, %c0_i32_0 : i32, i32
  }
  func.func @transform_4(%arg0: i32) -> (i32, i32) {
    %c0_i32 = arith.constant 0 : i32
    %c0_i32_0 = arith.constant 0 : i32
    %c0_i32_1 = arith.constant 0 : i32
    return %c0_i32, %c0_i32_0 : i32, i32
  }
  func.func @transform_5(%arg0: i32) -> (i32, i32) {
    %c0_i32 = arith.constant 0 : i32
    %c0_i32_0 = arith.constant 0 : i32
    %c0_i32_1 = arith.constant 0 : i32
    return %c0_i32, %c0_i32_0 : i32, i32
  }
  func.func @transform_6(%arg0: i32) -> (i32, i32) {
    %c0_i32 = arith.constant 0 : i32
    %c0_i32_0 = arith.constant 0 : i32
    %c0_i32_1 = arith.constant 0 : i32
    return %c0_i32, %c0_i32_0 : i32, i32
  }
  func.func @transform_7(%arg0: i32) -> (i32, i32) {
    %c0_i32 = arith.constant 0 : i32
    %c0_i32_0 = arith.constant 0 : i32
    %c0_i32_1 = arith.constant 0 : i32
    return %c0_i32, %c0_i32_0 : i32, i32
  }
  func.func @transform_8(%arg0: i32) -> (i32, i32) {
    %c0_i32 = arith.constant 0 : i32
    %c0_i32_0 = arith.constant 0 : i32
    %c0_i32_1 = arith.constant 0 : i32
    return %c0_i32, %c0_i32_0 : i32, i32
  }
  func.func @transform_9(%arg0: i32) -> (i32, i32) {
    %c0_i32 = arith.constant 0 : i32
    %c0_i32_0 = arith.constant 0 : i32
    %c0_i32_1 = arith.constant 0 : i32
    return %c0_i32, %c0_i32_0 : i32, i32
  }
  func.func @transform_10(%arg0: i32) -> (i32, i32) {
    %c0_i32 = arith.constant 0 : i32
    %c0_i32_0 = arith.constant 0 : i32
    %c0_i32_1 = arith.constant 0 : i32
    return %c0_i32, %c0_i32_0 : i32, i32
  }
  func.func @transform_11(%arg0: i32) -> (i32, i32, i32) {
    %c0_i32 = arith.constant 0 : i32
    %c0_i32_0 = arith.constant 0 : i32
    %c0_i32_1 = arith.constant 0 : i32
    return %arg0, %c0_i32, %c0_i32_0 : i32, i32, i32
  }
}

</mosaic_0001>

<bundles_post_ra>
// kernel: tpu_custom_call.1
= control target key start
LH: loop header
LB: loop body
LE: loop exit
PB: predicated region body
PF: predicated region fallthrough
CT: control target
= control target key end

     0   :  { %s6280_s0 = inlined_call_operand.hbm [shape: f32[4,8,32], index: 0, kind: input, shape index: {}]   ;;  %s6281_s1 = inlined_call_operand.vmem [shape: f32[1,32], index: 1, kind: input, shape index: {}]   ;;  %s6282_s2 = inlined_call_operand.vmem [shape: f32[1,32], index: 2, kind: input, shape index: {}]   ;;  %s6283_s3 = inlined_call_operand.vmem [shape: f32[8,8], index: 3, kind: input, shape index: {}]   ;;  %s6284_s4 = inlined_call_operand.vmem [shape: f32[8,1], index: 4, kind: input, shape index: {}]   ;;  %s6285_s5 = inlined_call_operand.hbm [shape: f32[8,8], index: 5, kind: input, shape index: {}]   ;;  %s6286_s6 = inlined_call_operand.vmem [shape: f32[8,1], index: 6, kind: input, shape index: {}]   ;;  %s6287_s7 = inlined_call_operand.vmem [shape: f32[32,32], index: 7, kind: input, shape index: {}]   ;;  %s6288_s8 = inlined_call_operand.vmem [shape: f32[1,32], index: 8, kind: input, shape index: {}]   ;;  %s6289_s9 = inlined_call_operand.hbm [shape: f32[32,32], index: 9, kind: input, shape index: {}]   ;;  %s6290_s10 = inlined_call_operand.vmem [shape: f32[1,32], index: 10, kind: input, shape index: {}]   ;;  %s6291_s11 = inlined_call_operand.hbm [shape: f32[4,8,32], index: 11, kind: output, shape index: {}]  }
   0x1   :  { %6305 = sst [smem:[#allocation18_spill]] %s6285_s5 }
   0x2   :  { %6306 = sst [smem:[#allocation19_spill]] %s6291_s11 }
   0x3   :  { %16 = vsyncpa [#allocation3], 0 }
   0x4   :  { %18 = vsyncpa [#allocation3 + $0x1], 0 }
   0x5   :  { %19 = vsyncpa [#allocation6], 0 }
   0x6   :  { %20 = vsyncpa [#allocation4], 0 }
   0x7   :  { %22 = vsyncpa [#allocation4 + $0x1], 0  ;;  %s5678_s17 = smov 0   ;;  %s5680_s18 = smov 0  }
   0x8   :  { %s5682_s19 = smov 0   ;;  %s5684_s20 = smov 0  }
   0x9 LB: > { %6307 = sst [smem:[#allocation12_spill]] %s5592_s17  ;;  %s5699_s21 = sadd.s32 4294967295, %s5604_s20   ;;  %s5604_s20 = sphi %s5684_s20, %s6334_s20   ;;  %s5600_s19 = sphi %s5682_s19, %s6336_s19   ;;  %s5596_s18 = sphi %s5680_s18, %s6338_s18   ;;  %s5592_s17 = sphi %s5678_s17, %s6337_s17  }
   0xa   : > { %6308 = sst [smem:[#allocation13_spill]] %s5600_s19  ;;  %s4543_s22 = sadd.s32 4294967294, %s5604_s20  }
   0xb   : > { %s5703_s23 = sadd.s32 1, %s5604_s20   ;;  %s35_s24 = sadd.s32 1, %s5600_s19 }
   0xc   : > { %6309 = sst [smem:[#allocation14_spill]] %s5703_s23  ;;  %s32_s25 = ssub.s32 %s5604_s20, %s5703_s23 }
   0xd   : > { %p42_p0 = scmp.ne.s32.totalorder %s5600_s19, %s5596_s18  ;;  %p33_p1 = scmp.eq.s32.totalorder %s32_s25, 0 }
   0xe   : > { %p43_p2 = scmp.eq.s32.totalorder %s5604_s20, 0  ;;  %p48_p3 = scmp.ne.s32.totalorder %s5596_s18, %s5592_s17 }
   0xf   : > { %p6292_p4 = scmp.eq.s32.totalorder %s5699_s21, 0  ;;  %p282_p7 = scmp.eq.s32.totalorder %s5699_s21, 1 }
  0x10   : > { %s5715_s26 = scalar_select %p33_p1, %s5600_s19, %s35_s24  }
  0x11   : > { %p5717_p5 = por %p43_p2, %p42_p0  ;;  %p5723_p6 = por %p6292_p4, %p48_p3 }
  0x12   : > { %6310 = sst [smem:[#allocation15_spill]] %s5715_s26  ;;  %p288_p8 = scmp.eq.s32.totalorder %s4543_s22, 1 }
  0x13   : > { %s6312_s28 = scalar_select %p5723_p6, 1, 0 }
  0x14   : > { %p4544_p9 = scmp.ge.s32.totalorder %s5604_s20, 1  ;;  %p295_p10 = scmp.lt.s32.totalorder %s5604_s20, 3 }
  0x15   : > { %p5730_p11 = por %p282_p7, %p42_p0  ;;  %p5734_p12 = por %p288_p8, %p48_p3 }
  0x16   : > { %p5738_p13 = pnand %p4544_p9, %p295_p10  ;;  %s5606_s13 = smov [#allocation5]  }
  0x17   : > { %s6313_s29 = scalar_select %p5730_p11, 1, 0 }
  0x18   : > { %s6315_s30 = scalar_select %p5734_p12, 1, 0 }
  0x19   : > { %6314 = sst [smem:[#allocation16_spill]] %s6313_s29  ;;  %p5349_p2 = pneg %p5738_p13 }
  0x1a   : > { %6316 = sst [smem:[#allocation17_spill]] %s6315_s30  ;;  %s320_s14 = sshll.u32 %s5606_s13, 4  ;;  %s321_s14 = int_to_ptr.vmem [resolvable:$true] %s320_s14 }
  0x1b   : > { %s6317_s12 = scalar_select %p5738_p13, 1, 0 }
  0x1c   : > { %p5366_p4 = scmp.lt.s32.totalorder %s5604_s20, 2  ;;  %p6318_p0 = scmp.eq.s32.totalorder %s5699_s21, 0 }
  0x1d   : > { %s5607_s22 = smov [#allocation7]   ;;  %s6321_s5 = sld [smem:[#allocation18_spill]] }
  0x1e   : > { %p5748_p7 = pnand %p5349_p2, %p6318_p0  ;;  %p5754_p3 = pnand %p5366_p4, %p5717_p5 }
  0x1f   : > { %s339_s24 = sshll.u32 %s5607_s22, 4  ;;  %s5758_s24 = int_to_ptr.vmem [resolvable:$true] %s339_s24 }
  0x20   : > { %s6320_s16 = scalar_select %p5754_p3, 1, 0 }
  0x21   : > { %p5450_p9 = pneg %p5748_p7 }
  0x23   : > { %s5448_s26 = scalar_lea.hbm %s6321_s5, 128 }
  0x24   : > { %p5449_p8 = scmp.ne.s32.totalorder %s6321_s5, %s5448_s26  ;;  %p5455_p10 = scmp.lt.u32.totalorder %s5448_s26, %s6321_s5 }
  0x26   : > { %p5451_p4 = pnand %p5450_p9, %p5449_p8 }
  0x28   : > { %p5452_p5 = pneg %p5451_p4 }
  0x2a   : > { %p5457_p2 = pnand %p5455_p10, %p5452_p5 }
  0x2c   : > { %5460 = shalt.err (!%p5457_p2)
}
  0x2d   : > { %s5461_s22 = scalar_lea.vmem %s321_s14, 128  ;;  %p5469_p11 = scmp.lt.s32.totalorder %s321_s14, %s321_s14 }
  0x2e   : > { %p5462_p0 = scmp.ne.s32.totalorder %s321_s14, %s5461_s22  ;;  %p5470_p6 = scmp.lt.s32.totalorder %s5461_s22, %s5461_s22 }
  0x30   : > { %p5464_p1 = pnand %p5462_p0, %p5450_p9  ;;  %p5471_p13 = por %p5470_p6, %p5469_p11 }
  0x32   : > { %p5465_p12 = pneg %p5464_p1 }
  0x34   : > { %p5472_p3 = pnand %p5471_p13, %p5465_p12 }
  0x36   : > { %5475 = shalt.err (!%p5472_p3)
}
  0x37   : > { %5352 = dma.hbm_to_vmem [thread:$0]  (!%p5748_p7), %s6321_s5, 128, %s321_s14, [#allocation6]  }
  0x38   : > { %s356_s17 = sand.u32 1, %s5600_s19   ;;  %s5476_s13 = scalar_lea.hbm %s6289_s9, 512 }
  0x39   : > { %p5477_p1 = scmp.ne.s32.totalorder %s6289_s9, %s5476_s13  ;;  %p5483_p12 = scmp.lt.u32.totalorder %s5476_s13, %s6289_s9 }
  0x3b   : > { %p5479_p6 = pnand %p5477_p1, %p5450_p9 }
  0x3d   : > { %p5480_p11 = pneg %p5479_p6 }
  0x3f   : > { %p5485_p13 = pnand %p5483_p12, %p5480_p11 }
  0x41   : > { %5488 = shalt.err (!%p5485_p13)
}
  0x42   : > { %s5489_s14 = scalar_lea.vmem %s5758_s24, 512  ;;  %p5497_p5 = scmp.lt.s32.totalorder %s5758_s24, %s5758_s24 }
  0x43   : > { %p5490_p3 = scmp.ne.s32.totalorder %s5758_s24, %s5489_s14  ;;  %p5498_p10 = scmp.lt.s32.totalorder %s5489_s14, %s5489_s14 }
  0x45   : > { %p5492_p8 = pnand %p5490_p3, %p5450_p9  ;;  %p5499_p2 = por %p5498_p10, %p5497_p5 }
  0x47   : > { %p5493_p4 = pneg %p5492_p8 }
  0x49   : > { %p5500_p0 = pnand %p5499_p2, %p5493_p4 }
  0x4b   : > { %5503 = shalt.err (!%p5500_p0)
}
  0x4c   : > { %s5608_s11 = smov 128   ;;  %s5609_s29 = smov 8  }
  0x4d   : > { %5355 = dma.hbm_to_vmem [thread:$0]  (!%p5748_p7), %s6289_s9, 512, %s5758_s24, [#allocation6], %s5608_s11, %s5608_s11, %s5609_s29  }
  0x4e   : > { %s4548_s26 = sshll.u32 %s356_s17, 4  ;;  %s4573_s25 = sshll.u32 %s5604_s20, 8 }
  0x4f   : > { %s5815_s22 = scalar_lea.hbm %s6280_s0, %s4573_s25  ;;  %s360_s14 = scalar_lea.vmem [#allocation2], %s4548_s26 }
  0x50   : > { %s367_s15 = sshll.u32 %s360_s14, 4  ;;  %s5819_s5 = scalar_lea.sflag [#allocation3], %s356_s17  ;;  %s5817_s15 = int_to_ptr.vmem [resolvable:$true] %s367_s15 }
  0x51   : > { %s5504_s19 = scalar_lea.hbm %s5815_s22, 256  ;;  %p6322_p7 = scmp.ne.s32.totalorder %s6320_s16, 0 }
  0x52   : > { %p5505_p9 = scmp.ne.s32.totalorder %s5815_s22, %s5504_s19  ;;  %s5509_s30 = scalar_lea.hbm %s6280_s0, 512 }
  0x53   : > { %p5506_p1 = pneg %p6322_p7  ;;  %p5510_p12 = scmp.lt.u32.totalorder %s5815_s22, %s6280_s0 }
  0x54   : > { %p5511_p13 = scmp.lt.u32.totalorder %s5509_s30, %s5504_s19  ;;  %p5513_p8 = scmp.lt.u32.totalorder %s5504_s19, %s5815_s22 }
  0x55   : > { %p5507_p6 = pnand %p5506_p1, %p5505_p9 }
  0x56   : > { %p5512_p3 = por %p5511_p13, %p5510_p12 }
  0x57   : > { %p5508_p11 = pneg %p5507_p6 }
  0x58   : > { %p5514_p4 = por %p5513_p8, %p5512_p3 }
  0x5a   : > { %p5515_p5 = pnand %p5514_p4, %p5508_p11 }
  0x5c   : > { %5518 = shalt.err (!%p5515_p5)
}
  0x5d   : > { %s5519_s17 = scalar_lea.vmem %s5817_s15, 256  ;;  %s5610_s26 = smov [#allocation2]  }
  0x5e   : > { %p5520_p10 = scmp.ne.s32.totalorder %s5817_s15, %s5519_s17  ;;  %s5524_s27 = sshll.u32 %s5610_s26, 4  ;;  %s5525_s27 = int_to_ptr.vmem [resolvable:$false] %s5524_s27 }
  0x5f   : > { %s5526_s14 = scalar_lea.vmem %s5525_s27, 512  ;;  %p5527_p9 = scmp.lt.s32.totalorder %s5817_s15, %s5525_s27 }
  0x60   : > { %p5522_p2 = pnand %p5520_p10, %p5506_p1  ;;  %p5528_p6 = scmp.lt.s32.totalorder %s5526_s14, %s5519_s17 }
  0x62   : > { %p5523_p0 = pneg %p5522_p2  ;;  %p5529_p12 = por %p5528_p6, %p5527_p9 }
  0x64   : > { %p5530_p13 = pnand %p5529_p12, %p5523_p0 }
  0x66   : > { %5533 = shalt.err (!%p5530_p13)
}
  0x67   : > { %5359 = dma.hbm_to_vmem [thread:$0]  (!%p6322_p7), %s5815_s22, 256, %s5817_s15, %s5819_s5, %s5608_s11, %s5608_s11, %s5609_s29  }
  0x68   : > { %p6323_p1 = scmp.ne.s32.totalorder %s6317_s12, 0 }
  0x69   : > { %s5853_s19 = sand.u32 (!%p6323_p1), 1, %s5596_s18   ;;  %p6324_p11 = scmp.ne.s32.totalorder (!%p6323_p1), %s6312_s28, 0 }
  0x6a   : > { %379 = sbr.rel (%p6323_p1) target bundleno = 1933 (0x78d), region = 64  ;;  %s4552_s24 = sshll.u32 (!%p6323_p1), %s5853_s19, 4 }
  0x6b   : > { %s382_s23 = scalar_lea.sflag (!%p6323_p1), [#allocation3], %s5853_s19  ;;  %s5859_s16 = scalar_lea.vmem (!%p6323_p1), [#allocation2], %s4552_s24 }
  0x71   : > { %5579 = dma.done.wait (%p6324_p11), %s382_s23, 256  }
  0x72   : > { %5581 = vsyncadd (%p6324_p11), %s382_s23, 4294967040  ;;  %p6325_p7 = scmp.eq.s32.totalorder %s5699_s21, 0 }
  0x74   : > { %5583 = dma.done.wait (%p6325_p7), [#allocation6], 640   ;;  %p6326_p3 = pmov %p6325_p7 }
  0x75   : > { %vm448_vm0 = vcmask 261120   ;;  %v434_v0 = vld [vmem:[%s5859_s16] sm:$0xff]  ;;  %v435_v1 = vld [vmem:[%s5859_s16 + $0x8] sm:$0xff]  ;;  %v5611_v14 = vmov 0.0   ;;  %vm5612_vm1 = vmmov 0   ;;  %v5613_v16 = vmov 0  }
  0x76   : > { %5585 = vsyncadd (%p6326_p3), [#allocation6], 4294966656  ;;  %v449_v2 = vsel %vm448_vm0, %v434_v0, 0.0  ;;  %v452_v3 = vsel %vm448_vm0, %v435_v1, 0.0  ;;  %4743 = vmatprep.subr.mxu0 %v5611_v14  ;;  %4773 = vmatprep.subr.mxu1 %v5611_v14  ;;  %v508_v15 = vld [vmem:[%s6284_s4] sm:$0xff]  ;;  %vm514_vm2 = vcmask 64512  }
  0x77   : > { %450 = vadd.xlane.f32.xlu0 %v449_v2  ;;  %4745 = vmatprep.mubr.msk.f32.mxu0 %vm5612_vm1, %v5611_v14  ;;  %v438_v23 = vld [vmem:[%s6283_s3] sm:$0xff]  ;;  %s431_s30 = scalar_lea.vmem [#allocation8], %s4552_s24  ;;  %s6327_s25 = sld [smem:[#allocation16_spill]] }
  0x78   : > { %4775 = vmatprep.mubr.msk.f32.mxu1 %vm5612_vm1, %v5611_v14  ;;  %5412 = vset.pattern.permute.xlu0 %v5613_v16  ;;  %v516_v27 = vsel %vm514_vm2, %v438_v23, 0  ;;  %v5894_v39 = vld [vmem:[%s6281_s1] ss:$0 sm:$0xff]  ;;  %s4574_s24 = sshll.u32 %s5699_s21, 8  ;;  %s4451_s13 = sshll.u32 %s431_s30, 4  ;;  %s6235_s13 = int_to_ptr.vmem [resolvable:$true] %s4451_s13 }
  0x79   : > { %5413 = vset.pattern.permute.xlu1 %v5613_v16  ;;  %v5888_v32 = vand.u32 4294901760, %v516_v27  ;;  %v5899_v41 = vld [vmem:[%s6282_s2] ss:$0 sm:$0xff]  ;;  %s6328_s27 = sld [smem:[#allocation19_spill]]  ;;  %s4438_s23 = scalar_lea.sflag [#allocation4], %s5853_s19 }
  0x7a   : > { %v1464_v60 = vld [vmem:[%s6286_s6] sm:$0xff]  ;;  %s5534_s21 = scalar_lea.vmem %s6235_s13, 256 }
  0x7b   : > { %453 = vadd.xlane.f32.xlu0 %v452_v3  ;;  %v585_v36 = vsub.f32 %v516_v27, %v5888_v32  ;;  %p5535_p8 = scmp.ne.s32.totalorder %s6235_s13, %s5534_s21 }
  0x7d   : > { %v586_v37 = vand.u32 4294901760, %v585_v36  ;;  %p6329_p4 = scmp.ne.s32.totalorder %s6327_s25, 0 }
  0x7f   : > { %v587_v42 = vsub.f32 %v585_v36, %v586_v37  ;;  %s6233_s14 = scalar_lea.hbm %s6328_s27, %s4574_s24  ;;  %p5536_p5 = pnand %p5535_p8, %p6329_p4 }
  0x81   : > { %v588_v46 = vand.u32 4294901760, %v587_v42  ;;  %p5537_p10 = pneg %p5536_p5 }
  0x91   : > { %511 = vperm.xlu0 %5412, %v508_v15  }
 0x104   : > { %v451_v4 = vpop.xlane.xlu0 %450 }
 0x105   : > { %v456_v5 = vmul.f32 0.03125, %v451_v4 }
 0x107   : > { %v458_v6 = vsub.f32 %v434_v0, %v456_v5 }
 0x108   : > { %v454_v7 = vpop.xlane.xlu0 %453 }
 0x109   : > { %v457_v8 = vmul.f32 0.03125, %v454_v7  ;;  %v460_v9 = vmul.f32 %v458_v6, %v458_v6 }
 0x10b   : > { %v459_v10 = vsub.f32 %v435_v1, %v457_v8  ;;  %v462_v11 = vsel %vm448_vm0, %v460_v9, 0.0 }
 0x10c   : > { %463 = vadd.xlane.f32.xlu1 %v462_v11 }
 0x10d   : > { %v461_v12 = vmul.f32 %v459_v10, %v459_v10 }
 0x10f   : > { %v465_v13 = vsel %vm448_vm0, %v461_v12, 0.0 }
 0x110   : > { %466 = vadd.xlane.f32.xlu1 %v465_v13  ;;  %v512_v61 = vpop.permute.xlu0 %511 }
 0x121   : > { %1467 = vperm.xlu1 %5413, %v1464_v60  }
 0x199   : > { %v464_v17 = vpop.xlane.xlu1 %463 }
 0x19a   : > { %v468_v18 = vmul.f32 0.03125, %v464_v17 }
 0x19c   : > { %v470_v19 = vadd.f32 1e-05, %v468_v18 }
 0x19d   : > { %v467_v20 = vpop.xlane.xlu1 %466 }
 0x19e   : > { %5414 = vrsqrt.f32 %v470_v19  ;;  %v469_v21 = vmul.f32 0.03125, %v467_v20  ;;  %vm474_vm3 = vcmp.eq.f32.partialorder %v470_v19, inf  ;;  %v477_v26 = vand.u32 2147483648, %v470_v19 }
 0x19f   : > { %vm476_vm4 = vcmp.eq.f32.partialorder %v470_v19, 0.0 }
 0x1a0   : > { %v471_v22 = vadd.f32 1e-05, %v469_v21 }
 0x1a2   : > { %5416 = vrsqrt.f32 %v471_v22  ;;  %vm481_vm5 = vcmp.eq.f32.partialorder %v471_v22, inf  ;;  %v484_v31 = vand.u32 2147483648, %v471_v22  ;;  %vm483_vm6 = vcmp.eq.f32.partialorder %v471_v22, 0.0 }
 0x1a8   : > { %v5415_v24 = vpop.eup %5414 }
 0x1a9   : > { %v473_v25 = vmul.f32 %v5415_v24, %v470_v19  ;;  %v439_v24 = vld [vmem:[#allocation5] sm:$0xff] }
 0x1ab   : > { %v475_v28 = vsel %vm474_vm3, %v470_v19, %v473_v25 }
 0x1ac   : > { %v478_v29 = vsel %vm476_vm4, %v477_v26, %v475_v28  ;;  %v5417_v30 = vpop.eup %5416 }
 0x1ad   : > { %5418 = vrcp.f32 %v478_v29  ;;  %v480_v33 = vmul.f32 %v5417_v30, %v471_v22  ;;  %v1471_v29 = vsel %vm514_vm2, %v439_v24, 0 }
 0x1af   : > { %v482_v34 = vsel %vm481_vm5, %v471_v22, %v480_v33  ;;  %v5951_v33 = vand.u32 4294901760, %v1471_v29 }
 0x1b0   : > { %v485_v35 = vsel %vm483_vm6, %v484_v31, %v482_v34 }
 0x1b1   : > { %5420 = vrcp.f32 %v485_v35 }
 0x1b7   : > { %v5419_v38 = vpop.eup %5418 }
 0x1b8   : > { %v490_v40 = vmul.f32 %v5419_v38, %v458_v6 }
 0x1ba   : > { %v498_v43 = vmul.f32 %v5894_v39, %v490_v40  ;;  %v1540_v40 = vsub.f32 %v1471_v29, %v5951_v33 }
 0x1bb   : > { %v5421_v44 = vpop.eup %5420 }
 0x1bc   : > { %v506_v45 = vadd.f32 %v5899_v41, %v498_v43  ;;  %v491_v47 = vmul.f32 %v5421_v44, %v459_v10 }
 0x1be   : > { %v519_v48 = vand.u32 4294901760, %v506_v45  ;;  %v499_v49 = vmul.f32 %v5894_v39, %v491_v47  ;;  %v1541_v47 = vand.u32 4294901760, %v1540_v40 }
 0x1c0   : > { %4744 = vmatpush3.msra.mxu0 %v519_v48  ;;  %v596_v50 = vsub.f32 %v506_v45, %v519_v48  ;;  %v507_v51 = vadd.f32 %v5899_v41, %v499_v49 }
 0x1c1   : > { %4746 = vmatmul.mubr.f32.vlgmr.msra.gmra.mrb[0].mxu0 %v588_v46  ;;  %4748 = vmatprep.subr.mxu0 %v5611_v14 }
 0x1c2   : > { %v597_v52 = vand.u32 4294901760, %v596_v50  ;;  %4750 = vmatprep.mubr.msk.f32.mxu0 %vm5612_vm1, %v5611_v14  ;;  %v965_v53 = vand.u32 4294901760, %v507_v51 }
 0x1c4   : > { %v598_v54 = vsub.f32 %v596_v50, %v597_v52  ;;  %4774 = vmatpush3.msra.mxu1 %v965_v53  ;;  %v1042_v55 = vsub.f32 %v507_v51, %v965_v53 }
 0x1c5   : > { %4776 = vmatmul.mubr.f32.vlgmr.msra.gmra.mrb[0].mxu1 %v588_v46  ;;  %4778 = vmatprep.subr.mxu1 %v5611_v14 }
 0x1c6   : > { %v599_v56 = vand.u32 4294901760, %v598_v54  ;;  %v1043_v57 = vand.u32 4294901760, %v1042_v55  ;;  %4780 = vmatprep.mubr.msk.f32.mxu1 %vm5612_vm1, %v5611_v14 }
 0x1c8   : > { %4749 = vmatpush3.msra.mxu0 %v599_v56  ;;  %v1044_v58 = vsub.f32 %v1042_v55, %v1043_v57 }
 0x1c9   : > { %4751 = vmatmul.mubr.f32.vlgmr.msra.gmra.mrb[0].mxu0 %v5888_v32  ;;  %4753 = vmatprep.subr.mxu0 %v5611_v14 }
 0x1ca   : > { %4754 = vmatpush3.msra.mxu0 %v596_v50  ;;  %4755 = vmatprep.mubr.msk.f32.mxu0 %vm5612_vm1, %v5611_v14  ;;  %v1045_v59 = vand.u32 4294901760, %v1044_v58 }
 0x1cb   : > { %4758 = vmatprep.subr.mxu0 %v5611_v14 }
 0x1cc   : > { %4779 = vmatpush3.msra.mxu1 %v1045_v59 }
 0x1cd   : > { %4781 = vmatmul.mubr.f32.vlgmr.msra.gmra.mrb[0].mxu1 %v5888_v32  ;;  %4783 = vmatprep.subr.mxu1 %v5611_v14 }
 0x1ce   : > { %4784 = vmatpush3.msra.mxu1 %v1042_v55  ;;  %4785 = vmatprep.mubr.msk.f32.mxu1 %vm5612_vm1, %v5611_v14 }
 0x1cf   : > { %4788 = vmatprep.subr.mxu1 %v5611_v14 }
 0x1d1   : > { %4756 = vmatmul.mubr.f32.vlgmr.msra.gmra.mrb[0].mxu0 %v585_v36 }
 0x1d2   : > { %4759 = vmatpush3.msra.mxu0 %v519_v48  ;;  %4760 = vmatprep.mubr.msk.f32.mxu0 %vm5612_vm1, %v5611_v14 }
 0x1d3   : > { %4763 = vmatprep.subr.mxu0 %v5611_v14 }
 0x1d5   : > { %4786 = vmatmul.mubr.f32.vlgmr.msra.gmra.mrb[0].mxu1 %v585_v36 }
 0x1d6   : > { %4789 = vmatpush3.msra.mxu1 %v965_v53  ;;  %4790 = vmatprep.mubr.msk.f32.mxu1 %vm5612_vm1, %v5611_v14 }
 0x1d7   : > { %4793 = vmatprep.subr.mxu1 %v5611_v14 }
 0x1d9   : > { %4761 = vmatmul.mubr.f32.vlgmr.msra.gmra.mrb[0].mxu0 %v586_v37 }
 0x1da   : > { %4764 = vmatpush3.msra.mxu0 %v597_v52  ;;  %4765 = vmatprep.mubr.msk.f32.mxu0 %vm5612_vm1, %v5611_v14 }
 0x1db   : > { %4768 = vmatprep.subr.mxu0 %v5611_v14 }
 0x1dd   : > { %4791 = vmatmul.mubr.f32.vlgmr.msra.gmra.mrb[0].mxu1 %v586_v37 }
 0x1de   : > { %4794 = vmatpush3.msra.mxu1 %v1043_v57  ;;  %4795 = vmatprep.mubr.msk.f32.mxu1 %vm5612_vm1, %v5611_v14 }
 0x1df   : > { %4798 = vmatprep.subr.mxu1 %v5611_v14 }
 0x1e1   : > { %4766 = vmatmul.mubr.f32.vlgmr.msra.gmra.mrb[0].mxu0 %v5888_v32 }
 0x1e2   : > { %4769 = vmatpush3.msra.mxu0 %v519_v48  ;;  %4770 = vmatprep.mubr.msk.f32.mxu0 %vm5612_vm1, %v5611_v14 }
 0x1e3   : > { %4803 = vmatprep.subr.mxu0 %v5611_v14 }
 0x1e5   : > { %4796 = vmatmul.mubr.f32.vlgmr.msra.gmra.mrb[0].mxu1 %v5888_v32 }
 0x1e6   : > { %4799 = vmatpush3.msra.mxu1 %v965_v53  ;;  %4800 = vmatprep.mubr.msk.f32.mxu1 %vm5612_vm1, %v5611_v14  ;;  %v1542_v53 = vsub.f32 %v1540_v40, %v1541_v47 }
 0x1e7   : > { %4833 = vmatprep.subr.mxu1 %v5611_v14 }
 0x1e8   : > { %v1543_v59 = vand.u32 4294901760, %v1542_v53 }
 0x1e9   : > { %4771 = vmatmul.mubr.f32.vlgmr.msra.gmra.mrb[0].mxu0 %v5888_v32 }
 0x1ea   : > { %4805 = vmatprep.mubr.msk.f32.mxu0 %vm5612_vm1, %v5611_v14 }
 0x1ed   : > { %4801 = vmatmul.mubr.f32.vlgmr.msra.gmra.mrb[0].mxu1 %v5888_v32 }
 0x1ee   : > { %4835 = vmatprep.mubr.msk.f32.mxu1 %vm5612_vm1, %v5611_v14 }
 0x2bc   : > { %v960_v62 = vpop.f32.mrb[0].mxu0 }
 0x2bd   : > { %v5271_v63 = vadd.f32 %v960_v62, %v512_v61  ;;  %v4772_v0 = vpop.f32.mrb[1].mxu0 }
 0x2bf   : > { %v1410_v1 = vmul.f32 0.70710677, %v5271_v63  ;;  %v1458_v54 = vmul.f32 0.5, %v5271_v63 }
 0x2c0   : > { %v1406_v3 = vpop.f32.mrb[0].mxu1 }
 0x2c1   : > { %v1412_v2 = vand.u32 2147483647, %v1410_v1  ;;  %v5272_v4 = vadd.f32 %v1406_v3, %v512_v61  ;;  %v4802_v5 = vpop.f32.mrb[1].mxu1  ;;  %vm1452_vm7 = vcmp.lt.f32.partialorder %v1410_v1, 0.0 }
 0x2c3   : > { %v1414_v6 = vmul.f32 0.3275911, %v1412_v2  ;;  %v1411_v7 = vmul.f32 0.70710677, %v5272_v4  ;;  %v1440_v12 = vsub.f32 0.0, %v1412_v2  ;;  %v1459_v62 = vmul.f32 0.5, %v5272_v4 }
 0x2c5   : > { %v1416_v8 = vadd.f32 1.0, %v1414_v6  ;;  %v1413_v9 = vand.u32 2147483647, %v1411_v7  ;;  %v1442_v15 = vmul.f32 %v1440_v12, %v1412_v2  ;;  %vm1453_vm8 = vcmp.lt.f32.partialorder %v1411_v7, 0.0 }
 0x2c7   : > { %5422 = vrcp.f32 %v1416_v8  ;;  %v1415_v10 = vmul.f32 0.3275911, %v1413_v9  ;;  %v1441_v17 = vsub.f32 0.0, %v1413_v9  ;;  %v1444_v19 = vmul.f32 1.442695, %v1442_v15 }
 0x2c9   : > { %v1417_v11 = vadd.f32 1.0, %v1415_v10  ;;  %v1443_v22 = vmul.f32 %v1441_v17, %v1413_v9  ;;  %v1468_v10 = vpop.permute.xlu1 %1467 }
 0x2cb   : > { %5424 = vrcp.f32 %v1417_v11  ;;  %v1446_v28 = vmul.f32 1.442695, %v1443_v22 }
 0x2cc   : > { %5426 = vpow2.f32 %v1444_v19 }
 0x2cd   : > { %5428 = vpow2.f32 %v1446_v28 }
 0x2d1   : > { %v5423_v13 = vpop.eup %5422 }
 0x2d2   : > { %v1422_v16 = vmul.f32 1.0614054, %v5423_v13 }
 0x2d4   : > { %v4558_v18 = vadd.f32 -1.4531521, %v1422_v16 }
 0x2d5   : > { %v5425_v20 = vpop.eup %5424 }
 0x2d6   : > { %v1426_v21 = vmul.f32 %v5423_v13, %v4558_v18  ;;  %v1423_v23 = vmul.f32 1.0614054, %v5425_v20  ;;  %v5427_v42 = vpop.eup %5426 }
 0x2d7   : > { %v5429_v49 = vpop.eup %5428 }
 0x2d8   : > { %v1428_v25 = vadd.f32 1.4214138, %v1426_v21  ;;  %v4559_v26 = vadd.f32 -1.4531521, %v1423_v23 }
 0x2da   : > { %v1430_v27 = vmul.f32 %v5423_v13, %v1428_v25  ;;  %v1427_v30 = vmul.f32 %v5425_v20, %v4559_v26 }
 0x2dc   : > { %v4560_v31 = vadd.f32 -0.28449672, %v1430_v27  ;;  %v1429_v32 = vadd.f32 1.4214138, %v1427_v30  ;;  %v440_v30 = vld [vmem:[%s6287_s7] sm:$0xff] }
 0x2de   : > { %v1434_v34 = vmul.f32 %v5423_v13, %v4560_v31  ;;  %v1431_v35 = vmul.f32 %v5425_v20, %v1429_v32  ;;  %v441_v31 = vld [vmem:[%s6287_s7 + $0x8] sm:$0xff]  ;;  %v442_v32 = vld [vmem:[%s6287_s7 + $0x10] sm:$0xff] }
 0x2e0   : > { %v1436_v36 = vadd.f32 0.2548296, %v1434_v34  ;;  %v4561_v37 = vadd.f32 -0.28449672, %v1431_v35  ;;  %v2424_v34 = vand.u32 4294901760, %v440_v30  ;;  %v2427_v35 = vand.u32 4294901760, %v441_v31 }
 0x2e2   : > { %v1438_v38 = vmul.f32 %v5423_v13, %v1436_v36  ;;  %v1435_v43 = vmul.f32 %v5425_v20, %v4561_v37  ;;  %v443_v36 = vld [vmem:[%s6287_s7 + $0x18] sm:$0xff]  ;;  %v2430_v37 = vand.u32 4294901760, %v442_v32 }
 0x2e4   : > { %v1448_v44 = vmul.f32 %v5427_v42, %v1438_v38  ;;  %v1437_v45 = vadd.f32 0.2548296, %v1435_v43  ;;  %v2433_v38 = vand.u32 4294901760, %v443_v36  ;;  %v2504_v43 = vsub.f32 %v440_v30, %v2424_v34 }
 0x2e6   : > { %v1450_v46 = vsub.f32 1.0, %v1448_v44  ;;  %v1439_v48 = vmul.f32 %v5425_v20, %v1437_v45  ;;  %v6031_v42 = vpack.c.bf16 %v2433_v38, %v2430_v37  ;;  %v2511_v44 = vsub.f32 %v441_v31, %v2427_v35 }
 0x2e7   : > { %v2505_v45 = vand.u32 4294901760, %v2504_v43 }
 0x2e8   : > { %v1454_v50 = vsub.f32 0.0, %v1450_v46  ;;  %v1449_v51 = vmul.f32 %v5429_v49, %v1439_v48  ;;  %v2518_v49 = vsub.f32 %v442_v32, %v2430_v37 }
 0x2ea   : > { %v1456_v52 = vsel %vm1452_vm7, %v1454_v50, %v1450_v46  ;;  %v1451_v56 = vsub.f32 1.0, %v1449_v51  ;;  %v2512_v46 = vand.u32 4294901760, %v2511_v44  ;;  %v2525_v50 = vsub.f32 %v443_v36, %v2433_v38 }
 0x2eb   : > { %v1460_v55 = vadd.f32 1.0, %v1456_v52  ;;  %v2519_v53 = vand.u32 4294901760, %v2518_v49 }
 0x2ec   : > { %v1455_v58 = vsub.f32 0.0, %v1451_v56  ;;  %v2513_v48 = vsub.f32 %v2511_v44, %v2512_v46 }
 0x2ed   : > { %v1462_v57 = vmul.f32 %v1460_v55, %v1458_v54  ;;  %v2526_v54 = vand.u32 4294901760, %v2525_v50 }
 0x2ee   : > { %v1457_v60 = vsel %vm1453_vm8, %v1455_v58, %v1451_v56  ;;  %v2514_v52 = vand.u32 4294901760, %v2513_v48  ;;  %v2520_v56 = vsub.f32 %v2518_v49, %v2519_v53  ;;  %v446_v48 = vld [vmem:[#allocation7 + $0x10] sm:$0xff] }
 0x2ef   : > { %v1474_v61 = vand.u32 4294901760, %v1462_v57  ;;  %v1461_v0 = vadd.f32 1.0, %v1457_v60 }
 0x2f0   : > { %v2521_v58 = vand.u32 4294901760, %v2520_v56 }
 0x2f1   : > { %4804 = vmatpush3.msra.mxu0 %v1474_v61  ;;  %v1551_v2 = vsub.f32 %v1462_v57, %v1474_v61  ;;  %v1463_v3 = vmul.f32 %v1461_v0, %v1459_v62  ;;  %v2527_v57 = vsub.f32 %v2525_v50, %v2526_v54  ;;  %v6042_v62 = vpack.c.bf16 %v2525_v50, %v2518_v49  ;;  %v447_v49 = vld [vmem:[#allocation7 + $0x18] sm:$0xff] }
 0x2f2   : > { %4806 = vmatmul.mubr.f32.vlgmr.msra.gmra.mrb[2].mxu0 %v1543_v59  ;;  %4808 = vmatprep.subr.mxu0 %v5611_v14  ;;  %v6044_v0 = vpack.c.bf16 %v2512_v46, %v2505_v45 }
 0x2f3   : > { %v1552_v1 = vand.u32 4294901760, %v1551_v2  ;;  %4810 = vmatprep.mubr.msk.f32.mxu0 %vm5612_vm1, %v5611_v14  ;;  %v1920_v63 = vand.u32 4294901760, %v1463_v3 }
 0x2f5   : > { %v1553_v5 = vsub.f32 %v1551_v2, %v1552_v1  ;;  %v1997_v6 = vsub.f32 %v1463_v3, %v1920_v63  ;;  %4834 = vmatpush3.msra.mxu1 %v1920_v63 }
 0x2f6   : > { %4836 = vmatmul.mubr.f32.vlgmr.msra.gmra.mrb[2].mxu1 %v1543_v59  ;;  %4838 = vmatprep.subr.mxu1 %v5611_v14  ;;  %v2528_v59 = vand.u32 4294901760, %v2527_v57 }
 0x2f7   : > { %v1554_v7 = vand.u32 4294901760, %v1553_v5  ;;  %v1998_v4 = vand.u32 4294901760, %v1997_v6  ;;  %4840 = vmatprep.mubr.msk.f32.mxu1 %vm5612_vm1, %v5611_v14 }
 0x2f8   : > { %v5137_v60 = vpack.c.bf16 %v2528_v59, %v2521_v58 }
 0x2f9   : > { %4809 = vmatpush3.msra.mxu0 %v1554_v7  ;;  %v1999_v8 = vsub.f32 %v1997_v6, %v1998_v4 }
 0x2fa   : > { %4811 = vmatmul.mubr.f32.vlgmr.msra.gmra.mrb[2].mxu0 %v5951_v33  ;;  %4813 = vmatprep.subr.mxu0 %v5611_v14 }
 0x2fb   : > { %4814 = vmatpush3.msra.mxu0 %v1551_v2  ;;  %4815 = vmatprep.mubr.msk.f32.mxu0 %vm5612_vm1, %v5611_v14  ;;  %v2000_v9 = vand.u32 4294901760, %v1999_v8  ;;  %v6046_v2 = vpack.c.bf16 %v2526_v54, %v2519_v53  ;;  %v3470_v53 = vand.u32 4294901760, %v447_v49 }
 0x2fc   : > { %4818 = vmatprep.subr.mxu0 %v5611_v14 }
 0x2fd   : > { %4839 = vmatpush3.msra.mxu1 %v2000_v9  ;;  %v3562_v56 = vsub.f32 %v447_v49, %v3470_v53 }
 0x2fe   : > { %4841 = vmatmul.mubr.f32.vlgmr.msra.gmra.mrb[2].mxu1 %v5951_v33  ;;  %4843 = vmatprep.subr.mxu1 %v5611_v14 }
 0x2ff   : > { %4844 = vmatpush3.msra.mxu1 %v1997_v6  ;;  %4845 = vmatprep.mubr.msk.f32.mxu1 %vm5612_vm1, %v5611_v14 }
 0x300   : > { %4848 = vmatprep.subr.mxu1 %v5611_v14 }
 0x302   : > { %4816 = vmatmul.mubr.f32.vlgmr.msra.gmra.mrb[2].mxu0 %v1540_v40 }
 0x303   : > { %4819 = vmatpush3.msra.mxu0 %v1474_v61  ;;  %4820 = vmatprep.mubr.msk.f32.mxu0 %vm5612_vm1, %v5611_v14 }
 0x304   : > { %4823 = vmatprep.subr.mxu0 %v5611_v14 }
 0x306   : > { %4846 = vmatmul.mubr.f32.vlgmr.msra.gmra.mrb[2].mxu1 %v1540_v40  ;;  %v6028_v40 = vpack.c.bf16 %v2427_v35, %v2424_v34 }
 0x307   : > { %4849 = vmatpush3.msra.mxu1 %v1920_v63  ;;  %4850 = vmatprep.mubr.msk.f32.mxu1 %vm5612_vm1, %v5611_v14 }
 0x308   : > { %4853 = vmatprep.subr.mxu1 %v5611_v14 }
 0x30a   : > { %4821 = vmatmul.mubr.f32.vlgmr.msra.gmra.mrb[2].mxu0 %v1541_v47 }
 0x30b   : > { %4824 = vmatpush3.msra.mxu0 %v1552_v1  ;;  %4825 = vmatprep.mubr.msk.f32.mxu0 %vm5612_vm1, %v5611_v14 }
 0x30c   : > { %4828 = vmatprep.subr.mxu0 %v5611_v14 }
 0x30e   : > { %4851 = vmatmul.mubr.f32.vlgmr.msra.gmra.mrb[2].mxu1 %v1541_v47  ;;  %v2506_v47 = vsub.f32 %v2504_v43, %v2505_v45 }
 0x30f   : > { %4854 = vmatpush3.msra.mxu1 %v1998_v4  ;;  %4855 = vmatprep.mubr.msk.f32.mxu1 %vm5612_vm1, %v5611_v14 }
 0x310   : > { %4858 = vmatprep.subr.mxu1 %v5611_v14  ;;  %v2507_v51 = vand.u32 4294901760, %v2506_v47 }
 0x312   : > { %4826 = vmatmul.mubr.f32.vlgmr.msra.gmra.mrb[2].mxu0 %v5951_v33  ;;  %v5134_v55 = vpack.c.bf16 %v2514_v52, %v2507_v51  ;;  %v3467_v52 = vand.u32 4294901760, %v446_v48 }
 0x313   : > { %4829 = vmatpush3.msra.mxu0 %v1474_v61  ;;  %4830 = vmatprep.mubr.msk.f32.mxu0 %vm5612_vm1, %v5611_v14  ;;  %v6040_v61 = vpack.c.bf16 %v2511_v44, %v2504_v43 }
 0x316   : > { %4856 = vmatmul.mubr.f32.vlgmr.msra.gmra.mrb[2].mxu1 %v5951_v33 }
 0x317   : > { %4859 = vmatpush3.msra.mxu1 %v1920_v63  ;;  %4860 = vmatprep.mubr.msk.f32.mxu1 %vm5612_vm1, %v5611_v14 }
 0x31a   : > { %4831 = vmatmul.mubr.f32.vlgmr.msra.gmra.mrb[2].mxu0 %v5951_v33 }
 0x31b   : > { %4871 = vmatprep.mubr.msk.f32.mxu0 %vm5612_vm1, %v5611_v14 }
 0x31e   : > { %4861 = vmatmul.mubr.f32.vlgmr.msra.gmra.mrb[2].mxu1 %v5951_v33  ;;  %v5614_v33 = vmov 0.0|0.0  }
 0x31f   : > { %4937 = vmatprep.mubr.msk.f32.mxu1 %vm5612_vm1, %v5611_v14  ;;  %5127 = vmatprep.subr.bf16.mxu0 %v5614_v33 }
 0x320   : > { %5163 = vmatprep.subr.bf16.mxu1 %v5614_v33  ;;  %5129 = vmatpush3.bf16.msra.mxu0 %v6028_v40 }
 0x321   : > { %5165 = vmatpush3.bf16.msra.mxu1 %v6028_v40  ;;  %5130 = vmatprep.subr.bf16.mxu0 %v5614_v33 }
 0x322   : > { %5166 = vmatprep.subr.bf16.mxu1 %v5614_v33 }
 0x324   : > { %5132 = vmatpush3.bf16.msra.mxu0 %v6031_v42 }
 0x325   : > { %5168 = vmatpush3.bf16.msra.mxu1 %v6031_v42  ;;  %5133 = vmatprep.subr.bf16.mxu0 %v5614_v33 }
 0x326   : > { %5169 = vmatprep.subr.bf16.mxu1 %v5614_v33 }
 0x3ed   : > { %v1915_v11 = vpop.f32.mrb[2].mxu0 }
 0x3ee   : > { %v5994_v12 = vadd.f32 %v1915_v11, %v1468_v10  ;;  %v4832_v13 = vpop.f32.mrb[3].mxu0 }
 0x3f0   : > { %v2367_v15 = vsel %vm448_vm0, %v5994_v12, 0.0 }
 0x3f1   : > { %2368 = vadd.xlane.f32.xlu1 %v2367_v15  ;;  %v2361_v16 = vpop.f32.mrb[2].mxu1 }
 0x3f2   : > { %v5998_v17 = vadd.f32 %v2361_v16, %v1468_v10  ;;  %v4862_v18 = vpop.f32.mrb[3].mxu1 }
 0x3f4   : > { %v2370_v19 = vsel %vm448_vm0, %v5998_v17, 0.0 }
 0x3f5   : > { %2371 = vadd.xlane.f32.xlu0 %v2370_v19 }
 0x47e   : > { %v2369_v20 = vpop.xlane.xlu1 %2368 }
 0x47f   : > { %v2373_v21 = vmul.f32 0.03125, %v2369_v20 }
 0x481   : > { %v6003_v22 = vsub.f32 %v5994_v12, %v2373_v21 }
 0x482   : > { %v2372_v23 = vpop.xlane.xlu0 %2371 }
 0x483   : > { %v2377_v24 = vmul.f32 %v6003_v22, %v6003_v22  ;;  %v2374_v25 = vmul.f32 0.03125, %v2372_v23 }
 0x485   : > { %v2379_v26 = vsel %vm448_vm0, %v2377_v24, 0.0  ;;  %v6009_v27 = vsub.f32 %v5998_v17, %v2374_v25 }
 0x486   : > { %2380 = vadd.xlane.f32.xlu1 %v2379_v26 }
 0x487   : > { %v2378_v28 = vmul.f32 %v6009_v27, %v6009_v27 }
 0x489   : > { %v2382_v29 = vsel %vm448_vm0, %v2378_v28, 0.0 }
 0x48a   : > { %2383 = vadd.xlane.f32.xlu1 %v2382_v29 }
 0x513   : > { %v2381_v3 = vpop.xlane.xlu1 %2380 }
 0x514   : > { %v2385_v1 = vmul.f32 0.03125, %v2381_v3 }
 0x516   : > { %v2387_v63 = vadd.f32 1e-05, %v2385_v1 }
 0x517   : > { %v2384_v5 = vpop.xlane.xlu1 %2383 }
 0x518   : > { %5430 = vrsqrt.f32 %v2387_v63  ;;  %v2386_v6 = vmul.f32 0.03125, %v2384_v5  ;;  %vm2391_vm9 = vcmp.eq.f32.partialorder %v2387_v63, inf  ;;  %v2394_v9 = vand.u32 2147483648, %v2387_v63 }
 0x519   : > { %vm2393_vm10 = vcmp.eq.f32.partialorder %v2387_v63, 0.0  ;;  %v6140_v5 = vpack.c.bf16 %v3470_v53, %v3467_v52 }
 0x51a   : > { %v2388_v7 = vadd.f32 1e-05, %v2386_v6 }
 0x51c   : > { %5432 = vrsqrt.f32 %v2388_v7  ;;  %vm2398_vm11 = vcmp.eq.f32.partialorder %v2388_v7, inf  ;;  %v2401_v16 = vand.u32 2147483648, %v2388_v7  ;;  %vm2400_vm12 = vcmp.eq.f32.partialorder %v2388_v7, 0.0 }
 0x522   : > { %v5431_v4 = vpop.eup %5430 }
 0x523   : > { %v2390_v8 = vmul.f32 %v5431_v4, %v2387_v63 }
 0x525   : > { %v2392_v10 = vsel %vm2391_vm9, %v2387_v63, %v2390_v8 }
 0x526   : > { %v2395_v11 = vsel %vm2393_vm10, %v2394_v9, %v2392_v10  ;;  %v5433_v13 = vpop.eup %5432  ;;  %v4562_v9 = vld [vmem:[%s6288_s8] ss:$0 sm:$0xff] }
 0x527   : > { %5434 = vrcp.f32 %v2395_v11  ;;  %v2397_v15 = vmul.f32 %v5433_v13, %v2388_v7 }
 0x529   : > { %v2399_v18 = vsel %vm2398_vm11, %v2388_v7, %v2397_v15 }
 0x52a   : > { %v2402_v19 = vsel %vm2400_vm12, %v2401_v16, %v2399_v18 }
 0x52b   : > { %5436 = vrcp.f32 %v2402_v19 }
 0x531   : > { %v5435_v20 = vpop.eup %5434 }
 0x532   : > { %v2407_v21 = vmul.f32 %v5435_v20, %v6003_v22 }
 0x534   : > { %v2409_v23 = vmul.f32 %v5894_v39, %v2407_v21 }
 0x535   : > { %v5437_v24 = vpop.eup %5436 }
 0x536   : > { %v2411_v25 = vadd.f32 %v5899_v41, %v2409_v23  ;;  %v2408_v26 = vmul.f32 %v5437_v24, %v6009_v27 }
 0x538   : > { %v2421_v28 = vsel %vm448_vm0, %v2411_v25, 0  ;;  %v2410_v30 = vmul.f32 %v5894_v39, %v2408_v26 }
 0x539   : > { %v6053_v29 = vand.u32 4294901760, %v2421_v28 }
 0x53a   : > { %v2412_v32 = vadd.f32 %v5899_v41, %v2410_v30  ;;  %v444_v41 = vld [vmem:[#allocation7] sm:$0xff] }
 0x53b   : > { %v2493_v31 = vsub.f32 %v2421_v28, %v6053_v29  ;;  %v3461_v44 = vand.u32 4294901760, %v444_v41 }
 0x53c   : > { %v2909_v22 = vsel %vm448_vm0, %v2412_v32, 0 }
 0x53d   : > { %v2494_v34 = vand.u32 4294901760, %v2493_v31  ;;  %v6059_v35 = vand.u32 4294901760, %v2909_v22  ;;  %v3541_v46 = vsub.f32 %v444_v41, %v3461_v44 }
 0x53f   : > { %v2495_v36 = vsub.f32 %v2493_v31, %v2494_v34  ;;  %v2981_v37 = vsub.f32 %v2909_v22, %v6059_v35  ;;  %v3542_v50 = vand.u32 4294901760, %v3541_v46 }
 0x541   : > { %v2496_v38 = vand.u32 4294901760, %v2495_v36  ;;  %v2982_v27 = vand.u32 4294901760, %v2981_v37 }
 0x543   : > { %4872 = vmatmul.mubr.f32.vlgmr.msra.gmra.mrb[4].mxu0 %v2496_v38  ;;  %v2983_v43 = vsub.f32 %v2981_v37, %v2982_v27 }
 0x544   : > { %5135 = vmatpush3.bf16.msra.mxu0 %v5134_v55  ;;  %4882 = vmatprep.mubr.msk.f32.mxu0 %vm5612_vm1, %v5611_v14 }
 0x545   : > { %5136 = vmatprep.subr.bf16.mxu0 %v5614_v33  ;;  %v2984_v39 = vand.u32 4294901760, %v2983_v43 }
 0x547   : > { %4938 = vmatmul.mubr.f32.vlgmr.msra.gmra.mrb[4].mxu1 %v2984_v39 }
 0x548   : > { %5138 = vmatpush3.bf16.msra.mxu0 %v5137_v60  ;;  %5171 = vmatpush3.bf16.msra.mxu1 %v5134_v55  ;;  %v3555_v55 = vsub.f32 %v446_v48, %v3467_v52 }
 0x549   : > { %5139 = vmatprep.subr.bf16.mxu0 %v5614_v33  ;;  %5172 = vmatprep.subr.bf16.mxu1 %v5614_v33 }
 0x54a   : > { %4948 = vmatprep.mubr.msk.f32.mxu1 %vm5612_vm1, %v5611_v14  ;;  %v3556_v59 = vand.u32 4294901760, %v3555_v55  ;;  %v6146_v7 = vpack.c.bf16 %v3562_v56, %v3555_v55 }
 0x54b   : > { %4883 = vmatmul.mubr.f32.vlgmr.msra.gmra.mrb[4].mxu0 %v6053_v29 }
 0x54c   : > { %5141 = vmatpush3.bf16.msra.mxu0 %v6040_v61  ;;  %4893 = vmatprep.mubr.msk.f32.mxu0 %vm5612_vm1, %v5611_v14 }
 0x54d   : > { %5174 = vmatpush3.bf16.msra.mxu1 %v5137_v60  ;;  %5142 = vmatprep.subr.bf16.mxu0 %v5614_v33  ;;  %v3563_v60 = vand.u32 4294901760, %v3562_v56 }
 0x54e   : > { %5175 = vmatprep.subr.bf16.mxu1 %v5614_v33 }
 0x54f   : > { %v6150_v8 = vpack.c.bf16 %v3563_v60, %v3556_v59 }
 0x550   : > { %4949 = vmatmul.mubr.f32.vlgmr.msra.gmra.mrb[4].mxu1 %v6059_v35  ;;  %5144 = vmatpush3.bf16.msra.mxu0 %v6042_v62 }
 0x551   : > { %5177 = vmatpush3.bf16.msra.mxu1 %v6040_v61  ;;  %5145 = vmatprep.subr.bf16.mxu0 %v5614_v33 }
 0x552   : > { %5178 = vmatprep.subr.bf16.mxu1 %v5614_v33  ;;  %4959 = vmatprep.mubr.msk.f32.mxu1 %vm5612_vm1, %v5611_v14 }
 0x553   : > { %4894 = vmatmul.mubr.f32.vlgmr.msra.gmra.mrb[4].mxu0 %v2493_v31 }
 0x554   : > { %5147 = vmatpush3.bf16.msra.mxu0 %v6028_v40  ;;  %4904 = vmatprep.mubr.msk.f32.mxu0 %vm5612_vm1, %v5611_v14 }
 0x555   : > { %5180 = vmatpush3.bf16.msra.mxu1 %v6042_v62  ;;  %5148 = vmatprep.subr.bf16.mxu0 %v5614_v33  ;;  %v3557_v62 = vsub.f32 %v3555_v55, %v3556_v59 }
 0x556   : > { %5181 = vmatprep.subr.bf16.mxu1 %v5614_v33 }
 0x558   : > { %4960 = vmatmul.mubr.f32.vlgmr.msra.gmra.mrb[4].mxu1 %v2981_v37  ;;  %5150 = vmatpush3.bf16.msra.mxu0 %v6031_v42 }
 0x559   : > { %5183 = vmatpush3.bf16.msra.mxu1 %v6028_v40  ;;  %5151 = vmatprep.subr.bf16.mxu0 %v5614_v33 }
 0x55a   : > { %5184 = vmatprep.subr.bf16.mxu1 %v5614_v33  ;;  %4970 = vmatprep.mubr.msk.f32.mxu1 %vm5612_vm1, %v5611_v14 }
 0x55b   : > { %4905 = vmatmul.mubr.f32.vlgmr.msra.gmra.mrb[4].mxu0 %v2494_v34 }
 0x55c   : > { %5153 = vmatpush3.bf16.msra.mxu0 %v6044_v0  ;;  %4915 = vmatprep.mubr.msk.f32.mxu0 %vm5612_vm1, %v5611_v14 }
 0x55d   : > { %5186 = vmatpush3.bf16.msra.mxu1 %v6031_v42  ;;  %5154 = vmatprep.subr.bf16.mxu0 %v5614_v33 }
 0x55e   : > { %5187 = vmatprep.subr.bf16.mxu1 %v5614_v33 }
 0x560   : > { %4971 = vmatmul.mubr.f32.vlgmr.msra.gmra.mrb[4].mxu1 %v2982_v27  ;;  %5156 = vmatpush3.bf16.msra.mxu0 %v6046_v2 }
 0x561   : > { %5189 = vmatpush3.bf16.msra.mxu1 %v6044_v0  ;;  %5157 = vmatprep.subr.bf16.mxu0 %v5614_v33  ;;  %v3564_v0 = vsub.f32 %v3562_v56, %v3563_v60 }
 0x562   : > { %5190 = vmatprep.subr.bf16.mxu1 %v5614_v33  ;;  %4981 = vmatprep.mubr.msk.f32.mxu1 %vm5612_vm1, %v5611_v14 }
 0x563   : > { %4916 = vmatmul.mubr.f32.vlgmr.msra.gmra.mrb[4].mxu0 %v6053_v29  ;;  %v3565_v3 = vand.u32 4294901760, %v3564_v0 }
 0x564   : > { %5159 = vmatpush3.bf16.msra.mxu0 %v6028_v40  ;;  %4926 = vmatprep.mubr.msk.f32.mxu0 %vm5612_vm1, %v5611_v14 }
 0x565   : > { %5192 = vmatpush3.bf16.msra.mxu1 %v6046_v2  ;;  %5160 = vmatprep.subr.bf16.mxu0 %v5614_v33  ;;  %v3558_v2 = vand.u32 4294901760, %v3557_v62 }
 0x566   : > { %5193 = vmatprep.subr.bf16.mxu1 %v5614_v33 }
 0x567   : > { %v6132_v1 = vpack.c.bf16 %v3565_v3, %v3558_v2 }
 0x568   : > { %4982 = vmatmul.mubr.f32.vlgmr.msra.gmra.mrb[4].mxu1 %v6059_v35  ;;  %5162 = vmatpush3.bf16.msra.mxu0 %v6031_v42 }
 0x569   : > { %5195 = vmatpush3.bf16.msra.mxu1 %v6028_v40  ;;  %4992 = vmatprep.mubr.msk.f32.mxu1 %vm5612_vm1, %v5611_v14  ;;  %v445_v40 = vld [vmem:[#allocation7 + $0x8] sm:$0xff] }
 0x56a   : > { %5196 = vmatprep.subr.bf16.mxu1 %v5614_v33  ;;  %5199 = vmatprep.subr.bf16.mxu0 %v5614_v33  ;;  %v3464_v45 = vand.u32 4294901760, %v445_v40 }
 0x56b   : > { %4927 = vmatmul.mubr.f32.vlgmr.msra.gmra.mrb[4].mxu0 %v6053_v29 }
 0x56c   : > { %5003 = vmatprep.mubr.msk.f32.mxu0 %vm5612_vm1, %v5611_v14  ;;  %v3548_v47 = vsub.f32 %v445_v40, %v3464_v45  ;;  %v6136_v63 = vpack.c.bf16 %v3464_v45, %v3461_v44 }
 0x56d   : > { %5198 = vmatpush3.bf16.msra.mxu1 %v6031_v42  ;;  %v3543_v42 = vsub.f32 %v3541_v46, %v3542_v50 }
 0x56e   : > { %5205 = vmatprep.subr.bf16.mxu1 %v5614_v33  ;;  %v3549_v51 = vand.u32 4294901760, %v3548_v47  ;;  %5201 = vmatpush3.bf16.msra.mxu0 %v6136_v63  ;;  %v6144_v6 = vpack.c.bf16 %v3548_v47, %v3541_v46 }
 0x56f   : > { %v3544_v57 = vand.u32 4294901760, %v3543_v42  ;;  %5202 = vmatprep.subr.bf16.mxu0 %v5614_v33 }
 0x570   : > { %4993 = vmatmul.mubr.f32.vlgmr.msra.gmra.mrb[4].mxu1 %v6059_v35  ;;  %v3550_v54 = vsub.f32 %v3548_v47, %v3549_v51  ;;  %v6148_v4 = vpack.c.bf16 %v3549_v51, %v3542_v50 }
 0x571   : > { %5014 = vmatprep.mubr.msk.f32.mxu1 %vm5612_vm1, %v5611_v14 }
 0x572   : > { %v3551_v58 = vand.u32 4294901760, %v3550_v54  ;;  %5204 = vmatpush3.bf16.msra.mxu0 %v6140_v5 }
 0x573   : > { %5211 = vmatprep.subr.bf16.mxu0 %v5614_v33 }
 0x574   : > { %v6128_v61 = vpack.c.bf16 %v3551_v58, %v3544_v57 }
 0x576   : > { %5207 = vmatpush3.bf16.msra.mxu1 %v6128_v61 }
 0x577   : > { %5208 = vmatprep.subr.bf16.mxu1 %v5614_v33 }
 0x57a   : > { %5210 = vmatpush3.bf16.msra.mxu1 %v6132_v1 }
 0x57b   : > { %5217 = vmatprep.subr.bf16.mxu1 %v5614_v33 }
 0x63e   : > { %v2904_v10 = vpop.f32.mrb[4].mxu0 }
 0x63f   : > { %v5275_v11 = vadd.f32 %v4562_v9, %v2904_v10  ;;  %v4928_v13 = vpop.f32.mrb[5].mxu0 }
 0x641   : > { %v3396_v15 = vmul.f32 0.70710677, %v5275_v11  ;;  %v3444_v62 = vmul.f32 0.5, %v5275_v11 }
 0x643   : > { %v3398_v16 = vand.u32 2147483647, %v3396_v15  ;;  %v3392_v18 = vpop.f32.mrb[4].mxu1  ;;  %vm3438_vm13 = vcmp.lt.f32.partialorder %v3396_v15, 0.0 }
 0x644   : > { %v6155_v19 = vadd.f32 %v4562_v9, %v3392_v18  ;;  %v4994_v20 = vpop.f32.mrb[5].mxu1 }
 0x645   : > { %v3400_v21 = vmul.f32 0.3275911, %v3398_v16  ;;  %v3426_v29 = vsub.f32 0.0, %v3398_v16 }
 0x646   : > { %v3397_v23 = vmul.f32 0.70710677, %v6155_v19 }
 0x647   : > { %v3402_v24 = vadd.f32 1.0, %v3400_v21  ;;  %v3428_v31 = vmul.f32 %v3426_v29, %v3398_v16  ;;  %v3445_v21 = vmul.f32 0.5, %v6155_v19 }
 0x648   : > { %v3399_v25 = vand.u32 2147483647, %v3397_v23  ;;  %vm3439_vm14 = vcmp.lt.f32.partialorder %v3397_v23, 0.0 }
 0x649   : > { %5438 = vrcp.f32 %v3402_v24  ;;  %v3430_v35 = vmul.f32 1.442695, %v3428_v31 }
 0x64a   : > { %v3401_v26 = vmul.f32 0.3275911, %v3399_v25  ;;  %v3427_v34 = vsub.f32 0.0, %v3399_v25 }
 0x64c   : > { %v3403_v28 = vadd.f32 1.0, %v3401_v26  ;;  %v3429_v38 = vmul.f32 %v3427_v34, %v3399_v25 }
 0x64e   : > { %5440 = vrcp.f32 %v3403_v28  ;;  %v3432_v40 = vmul.f32 1.442695, %v3429_v38 }
 0x64f   : > { %5442 = vpow2.f32 %v3430_v35 }
 0x650   : > { %5444 = vpow2.f32 %v3432_v40 }
 0x653   : > { %v5439_v30 = vpop.eup %5438 }
 0x654   : > { %v3408_v32 = vmul.f32 1.0614054, %v5439_v30 }
 0x656   : > { %v4563_v22 = vadd.f32 -1.4531521, %v3408_v32 }
 0x658   : > { %v5441_v36 = vpop.eup %5440  ;;  %v3412_v37 = vmul.f32 %v5439_v30, %v4563_v22 }
 0x659   : > { %v3409_v27 = vmul.f32 1.0614054, %v5441_v36  ;;  %v5443_v52 = vpop.eup %5442 }
 0x65a   : > { %v3414_v43 = vadd.f32 1.4214138, %v3412_v37  ;;  %v5445_v57 = vpop.eup %5444 }
 0x65b   : > { %v4564_v39 = vadd.f32 -1.4531521, %v3409_v27 }
 0x65c   : > { %v3416_v41 = vmul.f32 %v5439_v30, %v3414_v43 }
 0x65d   : > { %v3413_v44 = vmul.f32 %v5441_v36, %v4564_v39  ;;  %v5446_v39 = vld [vmem:[%s5859_s16] sm:$0xff] }
 0x65e   : > { %v4565_v45 = vadd.f32 -0.28449672, %v3416_v41  ;;  %v2365_v41 = vadd.f32 %v5446_v39, %v5994_v12 }
 0x65f   : > { %v3415_v46 = vadd.f32 1.4214138, %v3413_v44 }
 0x660   : > { %v3420_v47 = vmul.f32 %v5439_v30, %v4565_v45 }
 0x661   : > { %v3417_v48 = vmul.f32 %v5441_v36, %v3415_v46 }
 0x662   : > { %v3422_v49 = vadd.f32 0.2548296, %v3420_v47 }
 0x663   : > { %v4566_v50 = vadd.f32 -0.28449672, %v3417_v48 }
 0x664   : > { %v3424_v51 = vmul.f32 %v5439_v30, %v3422_v49 }
 0x665   : > { %v3421_v53 = vmul.f32 %v5441_v36, %v4566_v50 }
 0x666   : > { %v3434_v42 = vmul.f32 %v5443_v52, %v3424_v51 }
 0x667   : > { %v3423_v54 = vadd.f32 0.2548296, %v3421_v53 }
 0x668   : > { %v3436_v55 = vsub.f32 1.0, %v3434_v42 }
 0x669   : > { %v3425_v56 = vmul.f32 %v5441_v36, %v3423_v54 }
 0x66a   : > { %v3440_v58 = vsub.f32 0.0, %v3436_v55 }
 0x66b   : > { %v3435_v59 = vmul.f32 %v5445_v57, %v3425_v56 }
 0x66c   : > { %v3442_v60 = vsel %vm3438_vm13, %v3440_v58, %v3436_v55  ;;  %v5447_v58 = vld [vmem:[%s5859_s16 + $0x8] sm:$0xff]  ;;  %s5615_s16 = smov [#allocation8]  }
 0x66d   : > { %v3446_v0 = vadd.f32 1.0, %v3442_v60  ;;  %v3437_v2 = vsub.f32 1.0, %v3435_v59  ;;  %v2366_v59 = vadd.f32 %v5447_v58, %v5998_v17  ;;  %s5538_s5 = sshll.u32 %s5615_s16, 4  ;;  %s5539_s5 = int_to_ptr.vmem [resolvable:$false] %s5538_s5 }
 0x66e   : > { %s5540_s28 = scalar_lea.vmem %s5539_s5, 512  ;;  %p5541_p2 = scmp.lt.s32.totalorder %s6235_s13, %s5539_s5 }
 0x66f   : > { %v3448_v3 = vmul.f32 %v3446_v0, %v3444_v62  ;;  %v3441_v9 = vsub.f32 0.0, %v3437_v2  ;;  %p5542_p0 = scmp.lt.s32.totalorder %s5540_s28, %s5534_s21 }
 0x671   : > { %v3458_v10 = vsel %vm448_vm0, %v3448_v3, 0  ;;  %v3443_v18 = vsel %vm3439_vm14, %v3441_v9, %v3437_v2  ;;  %p5543_p9 = por %p5542_p0, %p5541_p2 }
 0x672   : > { %v3529_v13 = vand.u32 4294901760, %v3458_v10  ;;  %v3447_v11 = vadd.f32 1.0, %v3443_v18 }
 0x673   : > { %p5544_p6 = pnand %p5543_p9, %p5537_p10 }
 0x674   : > { %v3530_v16 = vsub.f32 %v3458_v10, %v3529_v13  ;;  %5015 = vmatmul.mubr.f32.vlgmr.msra.gmra.mrb[6].mxu1 %v3529_v13  ;;  %v3449_v24 = vmul.f32 %v3447_v11, %v3445_v21 }
 0x675   : > { %5219 = vmatpush3.bf16.msra.mxu1 %v6136_v63  ;;  %5036 = vmatprep.mubr.msk.f32.mxu1 %vm5612_vm1, %v5611_v14 }
 0x676   : > { %5220 = vmatprep.subr.bf16.mxu1 %v5614_v33  ;;  %v3531_v15 = vand.u32 4294901760, %v3530_v16  ;;  %v3946_v25 = vsel %vm448_vm0, %v3449_v24, 0 }
 0x677   : > { %v4017_v19 = vand.u32 4294901760, %v3946_v25 }
 0x678   : > { %v3532_v20 = vsub.f32 %v3530_v16, %v3531_v15 }
 0x679   : > { %5222 = vmatpush3.bf16.msra.mxu1 %v6140_v5  ;;  %v4018_v26 = vsub.f32 %v3946_v25, %v4017_v19 }
 0x67a   : > { %5229 = vmatprep.subr.bf16.mxu1 %v5614_v33  ;;  %v3533_v23 = vand.u32 4294901760, %v3532_v20 }
 0x67c   : > { %5037 = vmatmul.mubr.f32.vlgmr.msra.gmra.mrb[8].mxu1 %v3531_v15  ;;  %5004 = vmatmul.mubr.f32.vlgmr.msra.gmra.mrb[6].mxu0 %v3533_v23 }
 0x67d   : > { %5213 = vmatpush3.bf16.msra.mxu0 %v6144_v6  ;;  %5231 = vmatpush3.bf16.msra.mxu1 %v6136_v63 }
 0x67e   : > { %5214 = vmatprep.subr.bf16.mxu0 %v5614_v33  ;;  %5232 = vmatprep.subr.bf16.mxu1 %v5614_v33 }
 0x67f   : > { %5025 = vmatprep.mubr.msk.f32.mxu0 %vm5612_vm1, %v5611_v14  ;;  %5058 = vmatprep.mubr.msk.f32.mxu1 %vm5612_vm1, %v5611_v14 }
 0x681   : > { %5216 = vmatpush3.bf16.msra.mxu0 %v6146_v7  ;;  %5234 = vmatpush3.bf16.msra.mxu1 %v6140_v5 }
 0x682   : > { %5223 = vmatprep.subr.bf16.mxu0 %v5614_v33  ;;  %5241 = vmatprep.subr.bf16.mxu1 %v5614_v33 }
 0x684   : > { %5026 = vmatmul.mubr.f32.vlgmr.msra.gmra.mrb[8].mxu0 %v3530_v16  ;;  %5059 = vmatmul.mubr.f32.vlgmr.msra.gmra.mrb[10].mxu1 %v3529_v13 }
 0x685   : > { %5225 = vmatpush3.bf16.msra.mxu0 %v6148_v4  ;;  %5243 = vmatpush3.bf16.msra.mxu1 %v6128_v61  ;;  %v4019_v61 = vand.u32 4294901760, %v4018_v26 }
 0x686   : > { %5226 = vmatprep.subr.bf16.mxu0 %v5614_v33  ;;  %5244 = vmatprep.subr.bf16.mxu1 %v5614_v33 }
 0x687   : > { %5047 = vmatprep.mubr.msk.f32.mxu0 %vm5612_vm1, %v5611_v14  ;;  %5080 = vmatprep.mubr.msk.f32.mxu1 %vm5612_vm1, %v5611_v14  ;;  %v4020_v28 = vsub.f32 %v4018_v26, %v4019_v61 }
 0x689   : > { %5228 = vmatpush3.bf16.msra.mxu0 %v6150_v8  ;;  %5246 = vmatpush3.bf16.msra.mxu1 %v6132_v1  ;;  %v4021_v1 = vand.u32 4294901760, %v4020_v28 }
 0x68a   : > { %5235 = vmatprep.subr.bf16.mxu0 %v5614_v33  ;;  %5253 = vmatprep.subr.bf16.mxu1 %v5614_v33 }
 0x68c   : > { %5048 = vmatmul.mubr.f32.vlgmr.msra.gmra.mrb[10].mxu0 %v3529_v13  ;;  %5081 = vmatmul.mubr.f32.vlgmr.msra.gmra.mrb[12].mxu1 %v4017_v19 }
 0x68d   : > { %5237 = vmatpush3.bf16.msra.mxu0 %v6136_v63  ;;  %5255 = vmatpush3.bf16.msra.mxu1 %v6136_v63 }
 0x68e   : > { %5238 = vmatprep.subr.bf16.mxu0 %v5614_v33  ;;  %5256 = vmatprep.subr.bf16.mxu1 %v5614_v33 }
 0x68f   : > { %5069 = vmatprep.mubr.msk.f32.mxu0 %vm5612_vm1, %v5611_v14  ;;  %5102 = vmatprep.mubr.msk.f32.mxu1 %vm5612_vm1, %v5611_v14 }
 0x691   : > { %5240 = vmatpush3.bf16.msra.mxu0 %v6140_v5  ;;  %5258 = vmatpush3.bf16.msra.mxu1 %v6140_v5 }
 0x692   : > { %5247 = vmatprep.subr.bf16.mxu0 %v5614_v33  ;;  %5265 = vmatprep.subr.bf16.mxu1 %v5614_v33 }
 0x694   : > { %5070 = vmatmul.mubr.f32.vlgmr.msra.gmra.mrb[12].mxu0 %v4021_v1  ;;  %5103 = vmatmul.mubr.f32.vlgmr.msra.gmra.mrb[14].mxu1 %v4019_v61 }
 0x695   : > { %5249 = vmatpush3.bf16.msra.mxu0 %v6144_v6  ;;  %5267 = vmatpush3.bf16.msra.mxu1 %v6136_v63 }
 0x696   : > { %5250 = vmatprep.subr.bf16.mxu0 %v5614_v33  ;;  %5268 = vmatprep.subr.bf16.mxu1 %v5614_v33 }
 0x697   : > { %5091 = vmatprep.mubr.msk.f32.mxu0 %vm5612_vm1, %v5611_v14  ;;  %5124 = vmatprep.mubr.msk.f32.mxu1 %vm5612_vm1, %v5611_v14 }
 0x699   : > { %5252 = vmatpush3.bf16.msra.mxu0 %v6146_v7  ;;  %5270 = vmatpush3.bf16.msra.mxu1 %v6140_v5  ;;  %v4567_v5 = vld [vmem:[%s6290_s10] ss:$0 sm:$0xff] }
 0x69a   : > { %5259 = vmatprep.subr.bf16.mxu0 %v5614_v33 }
 0x69c   : > { %5092 = vmatmul.mubr.f32.vlgmr.msra.gmra.mrb[14].mxu0 %v4018_v26  ;;  %5125 = vmatmul.mubr.f32.vlgmr.msra.gmra.mrb[16].mxu1 %v4017_v19 }
 0x69d   : > { %5261 = vmatpush3.bf16.msra.mxu0 %v6148_v4  ;;  %5113 = vmatprep.mubr.msk.f32.mxu0 %vm5612_vm1, %v5611_v14 }
 0x69e   : > { %5262 = vmatprep.subr.bf16.mxu0 %v5614_v33 }
 0x6a1   : > { %5264 = vmatpush3.bf16.msra.mxu0 %v6150_v8 }
 0x6a4   : > { %5114 = vmatmul.mubr.f32.vlgmr.msra.gmra.mrb[16].mxu0 %v4017_v19 }
 0x747   : > { %v3626_v63 = vpop.f32.mrb[6].mxu1 }
 0x748   : > { %v5016_v6 = vpop.f32.mrb[7].mxu1 }
 0x74f   : > { %v3783_v7 = vpop.f32.mrb[8].mxu1  ;;  %v3535_v29 = vpop.f32.mrb[6].mxu0 }
 0x750   : > { %v3536_v30 = vadd.f32 %v4567_v5, %v3535_v29  ;;  %v5038_v31 = vpop.f32.mrb[9].mxu1  ;;  %v5005_v4 = vpop.f32.mrb[7].mxu0 }
 0x752   : > { %v3627_v32 = vadd.f32 %v3626_v63, %v3536_v30 }
 0x757   : > { %v3706_v14 = vpop.f32.mrb[8].mxu0  ;;  %v3941_v34 = vpop.f32.mrb[10].mxu1 }
 0x758   : > { %v3707_v33 = vadd.f32 %v3706_v14, %v3627_v32  ;;  %v5027_v22 = vpop.f32.mrb[9].mxu0  ;;  %v5060_v8 = vpop.f32.mrb[11].mxu1 }
 0x75a   : > { %v3784_v35 = vadd.f32 %v3783_v7, %v3707_v33 }
 0x75f   : > { %v3866_v36 = vpop.f32.mrb[10].mxu0  ;;  %v4114_v37 = vpop.f32.mrb[12].mxu1 }
 0x760   : > { %v3867_v38 = vadd.f32 %v3866_v36, %v3784_v35  ;;  %v5049_v27 = vpop.f32.mrb[11].mxu0  ;;  %v5082_v43 = vpop.f32.mrb[13].mxu1 }
 0x762   : > { %v3942_v40 = vadd.f32 %v3941_v34, %v3867_v38 }
 0x764   : > { %v4433_v44 = vadd.f32 %v3942_v40, %v2365_v41 }
 0x766   : > { %4435 = vst.msk [vmem:[%s431_s30] sm:$0xff] %vm448_vm0, %v4433_v44 }
 0x767   : > { %v4023_v45 = vpop.f32.mrb[12].mxu0  ;;  %v4271_v46 = vpop.f32.mrb[14].mxu1 }
 0x768   : > { %v4024_v47 = vadd.f32 %v4567_v5, %v4023_v45  ;;  %v5071_v48 = vpop.f32.mrb[13].mxu0  ;;  %v5104_v49 = vpop.f32.mrb[15].mxu1 }
 0x76a   : > { %v4115_v50 = vadd.f32 %v4114_v37, %v4024_v47 }
 0x76f   : > { %v4194_v51 = vpop.f32.mrb[14].mxu0  ;;  %v4429_v52 = vpop.f32.mrb[16].mxu1 }
 0x770   : > { %v4195_v53 = vadd.f32 %v4194_v51, %v4115_v50  ;;  %v5093_v42 = vpop.f32.mrb[15].mxu0  ;;  %v5126_v12 = vpop.f32.mrb[17].mxu1 }
 0x772   : > { %v4272_v54 = vadd.f32 %v4271_v46, %v4195_v53 }
 0x777   : > { %v4354_v55 = vpop.f32.mrb[16].mxu0 }
 0x778   : > { %v4355_v56 = vadd.f32 %v4354_v55, %v4272_v54  ;;  %v5115_v57 = vpop.f32.mrb[17].mxu0 }
 0x77a   : > { %v4430_v60 = vadd.f32 %v4429_v52, %v4355_v56 }
 0x77c   : > { %v4434_v62 = vadd.f32 %v4430_v60, %v2366_v59 }
 0x77e   : > { %4436 = vst.msk [vmem:[%s431_s30 + $0x8] sm:$0xff] %vm448_vm0, %v4434_v62 }
 0x77f   : > { %5547 = shalt.err (!%p5544_p6)
}
 0x780   : > { %s5548_s12 = scalar_lea.hbm %s6233_s14, 256  ;;  %s5552_s22 = scalar_lea.hbm %s6328_s27, 512 }
 0x781   : > { %p5549_p12 = scmp.ne.s32.totalorder %s6233_s14, %s5548_s12  ;;  %p5553_p11 = scmp.lt.u32.totalorder %s6233_s14, %s6328_s27 }
 0x782   : > { %p5554_p7 = scmp.lt.u32.totalorder %s5552_s22, %s5548_s12  ;;  %p5556_p8 = scmp.lt.u32.totalorder %s5548_s12, %s6233_s14 }
 0x783   : > { %p5550_p13 = pnand %p5549_p12, %p6329_p4 }
 0x784   : > { %p5555_p3 = por %p5554_p7, %p5553_p11 }
 0x785   : > { %p5551_p1 = pneg %p5550_p13 }
 0x786   : > { %p5557_p5 = por %p5556_p8, %p5555_p3 }
 0x788   : > { %p5558_p10 = pnand %p5557_p5, %p5551_p1 }
 0x78a   : > { %5561 = shalt.err (!%p5558_p10)
}
 0x78b   : > { %s5616_s24 = smov 128   ;;  %s5617_s17 = smov 8  }
 0x78c   : > { %5347 = dma.vmem_to_hbm [thread:$0]  (%p6329_p4), %s6235_s13, 256, %s6233_s14, %s4438_s23, %s5616_s24, %s5616_s24, %s5617_s17  }
 0x78d PF: > { %s6330_s26 = sld [smem:[#allocation12_spill]]  ;;  %s6331_s21 = sld [smem:[#allocation17_spill]] }
 0x78e   : > { %p6333_p0 = scmp.ge.s32.totalorder %s5604_s20, 2 }
 0x793   : > { %s4466_s16 = sand.u32 1, %s6330_s26   ;;  %p6332_p2 = scmp.ne.s32.totalorder %s6331_s21, 0 }
 0x794   : > { %s4467_s5 = scalar_lea.sflag [#allocation4], %s4466_s16 }
 0x795   : > { %p5361_p9 = pnand %p6333_p0, %p6332_p2 }
 0x797   : > { %5587 = dma.done.wait (!%p5361_p9), %s4467_s5, 256  }
 0x798   : > { %5589 = vsyncadd (!%p5361_p9), %s4467_s5, 4294967040  ;;  %s6334_s20 = sld [smem:[#allocation14_spill]]  ;;  %s6335_s28 = sld [smem:[#allocation13_spill]] }
 0x799   : > { %s6336_s19 = sld [smem:[#allocation15_spill]]  ;;  %s6337_s17 = smov %s5596_s18 }
 0x79e   : > { %p25_p6 = scmp.ge.s32.totalorder %s6334_s20, 4   ;;  %s6338_s18 = smov %s6335_s28 }
 0x7a0   :  { %27 = sbr.rel (!%p25_p6) target bundleno = 9 (0x9), region = 117 }
 0x7a7   :  { %4472 = vsyncpa [#allocation3], 1 }
 0x7a8   :  { %4474 = vsyncpa [#allocation3 + $0x1], 1 }
 0x7a9   :  { %4475 = vsyncpa [#allocation6], 1 }
 0x7aa   :  { %4476 = vsyncpa [#allocation4], 1 }
 0x7ab   :  { %4478 = vsyncpa [#allocation4 + $0x1], 1 }

</bundles_post_ra>
